<compile_context>
chip_gen: v6e
topology: v6e:2x2x1
jax: 0.10.0
libtpu: 0.0.40
codegen_flags: <defaults>
</compile_context>

<pallas_src>
import numpy as np
import jax
import jax.numpy as jnp
from jax import lax
from jax.experimental import pallas as pl
from jax.experimental.pallas import tpu as pltpu


_CompilerParams = (getattr(pltpu, "CompilerParams", None)
                   or getattr(pltpu, "TPUCompilerParams", None))


def _make_blur_kernel(k, factor):
    """Mirror of make_kernel(...) * factor**2 and the Upsample pad computation."""
    k = np.asarray(k, dtype=np.float32)
    if k.ndim == 1:
        k = np.outer(k, k)
    k = k / k.sum()
    k = k * (factor ** 2)
    p = k.shape[0] - factor
    pad0 = (p + 1) // 2 + factor - 1
    pad1 = p // 2
    return k, (pad0, pad1)


def _row_taps(kh, up, pad0):
    """Polyphase vertical taps: taps[py] = [(r, ky), ...] such that output row
    (up*oy + py) accumulates (input row oy + r) filtered with kernel row ky."""
    taps = []
    for py in range(up):
        t = []
        for dy in range(kh):
            if (py + dy - pad0) % up == 0:
                t.append(((py + dy - pad0) // up, kh - 1 - dy))
        taps.append(t)
    return taps


def _vmem_capacity_bytes():
    try:
        info_fn = getattr(pltpu, "get_tpu_info", None)
        if info_fn is not None:
            return int(info_fn().vmem_capacity_bytes)
    except Exception:
        pass
    return 64 << 20  # conservative: v7x physical VMEM per TensorCore


def _choose_tiling(B, H, halo, wsp, lane_out, itemsize, step_budget):
    """Pick (plane-group size PB, row tile, n_tiles, padded H) so a single grid
    step's input window + output block stays within `step_budget` bytes."""
    win_row = wsp * itemsize
    out_row = lane_out * itemsize
    plane_bytes = (H + halo) * win_row + H * out_row
    if plane_bytes <= step_budget:
        # Whole-plane tiles; batch PB planes per step (PB divides B -> free reshape).
        pb = 1
        pb_cap = max(1, min(B, step_budget // max(1, plane_bytes)))
        for d in range(pb_cap, 0, -1):
            if B % d == 0:
                pb = d
                break
        return pb, H, 1, H
    # Row-tiled mode, one plane per step.
    per_row = win_row + out_row
    cap = int((step_budget - halo * win_row) // max(1, per_row))
    cap = max(8, min(cap, H))
    cap8 = max(8, (cap // 8) * 8)
    for th in range(cap8, 7, -8):          # prefer an 8-aligned divisor of H
        if H % th == 0:
            return 1, th, H // th, H
    th = cap8                               # ragged last tile: pad rows, slice after
    n_t = -(-H // th)
    return 1, th, n_t, n_t * th


def _build_kernel(k2d, up, pad0, taps, min_r, tile_h, w_out, needs_cast):
    k2d = np.asarray(k2d, np.float32)
    kh, kw = k2d.shape

    # Distinct window-local row offsets and their (row-phase, kernel-row) users.
    users = {}
    for py, tp in enumerate(taps):
        for (r, ky) in tp:
            users.setdefault(r - min_r, []).append((py, ky))

    # Horizontal taps grouped in runs of `up` consecutive dx: within a group the
    # zero-stuffed lanes touched by each dx are disjoint and together cover every
    # lane, so the group's shifted slices are summed ONCE and multiplied by a single
    # lane-periodic weight row (saves ~half the VPU multiplies vs per-dx scalars).
    groups = [tuple(range(d0, min(d0 + up, kw))) for d0 in range(0, kw, up)]

    def wgt(ky, dx):
        return float(k2d[ky, kw - 1 - dx])

    def compute(src_ref):
        lane = lax.broadcasted_iota(jnp.int32, (1, 1, w_out), 2)
        wv_cache = {}

        def wvec(ky, gi):
            key = (ky, gi)
            if key not in wv_cache:
                wv = jnp.zeros((1, 1, w_out), jnp.float32)
                for dx in groups[gi]:
                    w = wgt(ky, dx)
                    if w == 0.0:
                        continue
                    sel = ((lane + ((dx - pad0) % up)) % up) == 0
                    wv = jnp.where(sel, jnp.float32(w), wv)
                wv_cache[key] = wv
            return wv_cache[key]

        accs = [None] * up
        for roff in sorted(users):
            us = users[roff]
            for gi, grp in enumerate(groups):
                live = [(py, ky) for (py, ky) in us
                        if any(wgt(ky, dx) != 0.0 for dx in grp)]
                if not live:
                    continue
                gs = None                       # shared group-sum slice (f32)
                for dx in grp:
                    sl = src_ref[:, roff:roff + tile_h, dx:dx + w_out]
                    gs = sl if gs is None else gs + sl
                for (py, ky) in live:
                    term = gs * wvec(ky, gi)
                    accs[py] = term if accs[py] is None else accs[py] + term
        return accs

    def store(o_ref, accs):
        pb = o_ref.shape[0]
        for py in range(up):
            acc = accs[py]
            if acc is None:
                # A row phase with no taps is genuinely all-zero (all of its
                # contributions come from zero-stuffed rows).
                acc = jnp.zeros((pb, tile_h, w_out), jnp.float32)
            o_ref[:, :, py * w_out:(py + 1) * w_out] = acc.astype(o_ref.dtype)

    if needs_cast:
        def kernel(win_ref, o_ref, w32_ref):
            w32_ref[...] = win_ref[...].astype(jnp.float32)   # one-shot upcast
            store(o_ref, compute(w32_ref))
    else:
        def kernel(win_ref, o_ref):
            store(o_ref, compute(win_ref))
    return kernel


def upfirdn2d_upsample(x, k2d, factor, pad, *, step_budget=None):
    """upfirdn2d(x, k2d, up=factor, down=1, pad=pad) for NCHW x (exact upsample pads)."""
    pad0, pad1 = pad
    N, C, H, W = x.shape
    kh, kw = np.asarray(k2d).shape
    up = int(factor)

    h_out = up * H + pad0 + pad1 - kh + 1
    w_out = up * W + pad0 + pad1 - kw + 1
    if h_out != up * H or w_out != up * W:
        # TODO(synk): general upfirdn2d (down>1 / non-exact-upsample pads) is not needed
        # by this module and not implemented here.
        raise NotImplementedError("pads must give an exact factor-x upsample")

    taps = _row_taps(kh, up, pad0)
    rs = [r for tp in taps for (r, _) in tp]
    min_r, max_r = min(rs), max(rs)
    halo = max_r - min_r
    pad_top = max(0, -min_r)
    pad_bot = max(0, max_r)
    s0 = min_r + pad_top                 # padded-plane row where a tile's window starts

    B = N * C
    wsp = up * W + pad0 + pad1           # stuffed + padded columns (= w_out + kw - 1)
    lane_out = up * w_out
    itemsize = jnp.dtype(x.dtype).itemsize

    vmem_cap = _vmem_capacity_bytes()
    if step_budget is None:
        # Bigger blocks on v5e/v6e (128 MiB VMEM), tighter on v7x (64 MiB).
        step_budget = (18 << 20) if vmem_cap >= (100 << 20) else (9 << 20)

    pb, tile_h, n_tiles, h_pad = _choose_tiling(
        B, H, halo, wsp, lane_out, itemsize, step_budget)
    n_groups = B // pb
    win_rows = tile_h + halo

    # One prep pass over the (factor^2-smaller) input: zero-stuff + pad the columns
    # exactly like upfirdn2d's horizontal intermediate, and zero-pad rows for the halo
    # (plus extra rows if the last row tile is ragged).
    # TODO(synk): folding this column zero-stuffing into the kernel would drop ~2x-input
    # bytes of extra HBM traffic, but needs an in-kernel lane-spread (risky lowering).
    x3 = x.reshape(B, H, W)
    xp = lax.pad(
        x3,
        jnp.zeros((), x3.dtype),
        ((0, 0, 0),
         (pad_top, pad_bot + (h_pad - H), 0),
         (pad0, pad1 + (up - 1), up - 1)),
    )

    if n_tiles == 1:
        windows = xp[:, s0:s0 + win_rows, :].reshape(n_groups, 1, pb, win_rows, wsp)
    else:
        windows = jnp.stack(
            [xp[:, s0 + t * tile_h: s0 + t * tile_h + win_rows, :]
             for t in range(n_tiles)],
            axis=1,
        ).reshape(B, n_tiles, 1, win_rows, wsp)

    needs_cast = x.dtype != jnp.float32
    kernel = _build_kernel(k2d, up, pad0, taps, min_r, tile_h, w_out, needs_cast)

    scratch = [pltpu.VMEM((pb, win_rows, wsp), jnp.float32)] if needs_cast else []

    win_block = pb * win_rows * wsp * itemsize
    out_block = pb * tile_h * lane_out * itemsize
    f32_work = pb * tile_h * w_out * 4 * (up + 2)
    w32_block = pb * win_rows * wsp * 4 if needs_cast else 0
    need = 2 * win_block + 2 * out_block + f32_work + w32_block + (8 << 20)
    vmem_limit = int(min(max(need, 32 << 20), vmem_cap - (8 << 20)))

    out5 = pl.pallas_call(
        kernel,
        out_shape=jax.ShapeDtypeStruct((n_groups, pb, h_pad, lane_out), x.dtype),
        grid=(n_groups, n_tiles),
        in_specs=[pl.BlockSpec((None, None, pb, win_rows, wsp),
                               lambda g, t: (g, t, 0, 0, 0))],
        out_specs=pl.BlockSpec((None, pb, tile_h, lane_out),
                               lambda g, t: (g, 0, t, 0)),
        scratch_shapes=scratch,
        compiler_params=_CompilerParams(
            dimension_semantics=("parallel", "parallel"),
            vmem_limit_bytes=vmem_limit,
        ),
    )(windows)

    # (n_groups, pb, h_pad, up*w_out) -> (N, C, up*H, w_out): pure metadata reshape
    # (row phases already sit contiguously after each output row group).
    out = out5.reshape(B, up * h_pad, w_out)
    if h_pad != H:
        out = out[:, :up * H, :]
    return out.reshape(N, C, up * H, w_out)


def upsample(x, kernel=(1, 3, 3, 1), factor=2):
    """Equivalent of Upsample(kernel, factor).forward(x) for NCHW input."""
    k2d, pad = _make_blur_kernel(kernel, factor)
    return upfirdn2d_upsample(x, k2d, factor, pad)


def _upfirdn2d_upsample_ref(x, k2d, factor, pad):
    """Pure numpy reference mirroring upfirdn2d_native (up=factor, down=1)."""
    x = np.asarray(x, np.float32)
    k = np.asarray(k2d, np.float32)
    pad0, pad1 = pad
    N, C, H, W = x.shape
    kh, kw = k.shape
    up = factor
    stuffed = np.zeros((N, C, up * H, up * W), np.float32)
    stuffed[:, :, ::up, ::up] = x
    padded = np.pad(stuffed, ((0, 0), (0, 0), (pad0, pad1), (pad0, pad1)))
    kf = k[::-1, ::-1]
    h_out = up * H + pad0 + pad1 - kh + 1
    w_out = up * W + pad0 + pad1 - kw + 1
    out = np.zeros((N, C, h_out, w_out), np.float32)
    for dy in range(kh):
        for dx in range(kw):
            out += padded[:, :, dy:dy + h_out, dx:dx + w_out] * kf[dy, dx]
    return out


if __name__ == "__main__":
    key = jax.random.PRNGKey(0)
    # Small NCHW input consistent with how Upsample is used (conv feature maps / RGB skips).
    x = jax.random.normal(key, (2, 4, 16, 16), dtype=jnp.float32)

    factor = 2
    blur = (1, 3, 3, 1)

    out = upsample(x, kernel=blur, factor=factor)
    out = jax.block_until_ready(out)

    k2d, pad = _make_blur_kernel(blur, factor)
    ref = _upfirdn2d_upsample_ref(np.asarray(x), k2d, factor, pad)

    assert out.shape == (2, 4, 32, 32) and out.dtype == x.dtype
    err = float(np.max(np.abs(np.asarray(out, np.float32) - ref)))
    assert np.allclose(np.asarray(out, np.float32), ref, atol=1e-4, rtol=1e-4), err

    print("KERNEL_OK")
</pallas_src>

<mosaic_0001>
module attributes {stable_mosaic.version = 11 : i64} {
  func.func @kernel(%arg0: i32, %arg1: i32, %arg2: memref<1x1x8x18x35xf32, #tpu.memory_space<vmem>>, %arg3: memref<1x8x16x64xf32, #tpu.memory_space<vmem>>) attributes {dimension_semantics = [#tpu.dimension_semantics<parallel>, #tpu.dimension_semantics<parallel>], iteration_bounds = array<i64: 1, 1>, scalar_prefetch = 0 : i64, scratch_operands = 0 : i64, tpu.core_type = #tpu.core_type<tc>, window_params = [{transform_indices = @transform_0, window_bounds = array<i64: 1, 1, 8, 18, 35>}, {transform_indices = @transform_1, window_bounds = array<i64: 1, 8, 16, 64>}]} {
    %0 = tpu.iota {dimensions = array<i32: 2>} : vector<1x1x32xi32>
    %c0 = arith.constant 0 : index
    %c0_0 = arith.constant 0 : index
    %c0_1 = arith.constant 0 : index
    %c0_2 = arith.constant 0 : index
    %c0_3 = arith.constant 0 : index
    %1 = vector.load %arg2[%c0, %c0_0, %c0_1, %c0_2, %c0_3] : memref<1x1x8x18x35xf32, #tpu.memory_space<vmem>>, vector<1x1x8x16x32xf32>
    %2 = vector.shape_cast %1 : vector<1x1x8x16x32xf32> to vector<8x16x32xf32>
    %c0_4 = arith.constant 0 : index
    %c0_5 = arith.constant 0 : index
    %c0_6 = arith.constant 0 : index
    %c0_7 = arith.constant 0 : index
    %c1 = arith.constant 1 : index
    %3 = vector.load %arg2[%c0_4, %c0_5, %c0_6, %c0_7, %c1] : memref<1x1x8x18x35xf32, #tpu.memory_space<vmem>>, vector<1x1x8x16x32xf32>
    %4 = vector.shape_cast %3 : vector<1x1x8x16x32xf32> to vector<8x16x32xf32>
    %5 = arith.addf %2, %4 : vector<8x16x32xf32>
    %cst = arith.constant 0.000000e+00 : f32
    %6 = vector.broadcast %cst : f32 to vector<1x1x32xf32>
    %c0_i32 = arith.constant 0 : i32
    %7 = vector.broadcast %c0_i32 : i32 to vector<1x1x32xi32>
    %8 = arith.addi %0, %7 : vector<1x1x32xi32>
    %c2_i32 = arith.constant 2 : i32
    %c0_i32_8 = arith.constant 0 : i32
    %9 = arith.cmpi eq, %c2_i32, %c0_i32_8 : i32
    %c1_i32 = arith.constant 1 : i32
    %10 = arith.select %9, %c1_i32, %c2_i32 : i32
    %11 = vector.broadcast %10 : i32 to vector<1x1x32xi32>
    %12 = arith.remsi %8, %11 : vector<1x1x32xi32>
    %c0_i32_9 = arith.constant 0 : i32
    %13 = vector.broadcast %c0_i32_9 : i32 to vector<1x1x32xi32>
    %14 = arith.cmpi ne, %12, %13 : vector<1x1x32xi32>
    %c0_i32_10 = arith.constant 0 : i32
    %15 = vector.broadcast %c0_i32_10 : i32 to vector<1x1x32xi32>
    %16 = arith.cmpi slt, %12, %15 : vector<1x1x32xi32>
    %c0_i32_11 = arith.constant 0 : i32
    %17 = arith.cmpi slt, %10, %c0_i32_11 : i32
    %18 = vector.broadcast %17 : i1 to vector<1x1x32xi1>
    %19 = vector.broadcast %18 : vector<1x1x32xi1> to vector<1x1x32xi1>
    %20 = arith.xori %16, %19 : vector<1x1x32xi1>
    %21 = arith.andi %20, %14 : vector<1x1x32xi1>
    %22 = vector.broadcast %10 : i32 to vector<1x1x32xi32>
    %23 = arith.addi %12, %22 : vector<1x1x32xi32>
    %24 = arith.select %21, %23, %12 : vector<1x1x32xi1>, vector<1x1x32xi32>
    %c0_i32_12 = arith.constant 0 : i32
    %25 = vector.broadcast %c0_i32_12 : i32 to vector<1x1x32xi32>
    %26 = arith.cmpi eq, %24, %25 : vector<1x1x32xi32>
    %cst_13 = arith.constant 6.250000e-02 : f32
    %27 = vector.broadcast %cst_13 : f32 to vector<1x1x32xf32>
    %28 = arith.select %26, %27, %6 : vector<1x1x32xi1>, vector<1x1x32xf32>
    %c1_i32_14 = arith.constant 1 : i32
    %29 = vector.broadcast %c1_i32_14 : i32 to vector<1x1x32xi32>
    %30 = arith.addi %0, %29 : vector<1x1x32xi32>
    %c2_i32_15 = arith.constant 2 : i32
    %c0_i32_16 = arith.constant 0 : i32
    %31 = arith.cmpi eq, %c2_i32_15, %c0_i32_16 : i32
    %c1_i32_17 = arith.constant 1 : i32
    %32 = arith.select %31, %c1_i32_17, %c2_i32_15 : i32
    %33 = vector.broadcast %32 : i32 to vector<1x1x32xi32>
    %34 = arith.remsi %30, %33 : vector<1x1x32xi32>
    %c0_i32_18 = arith.constant 0 : i32
    %35 = vector.broadcast %c0_i32_18 : i32 to vector<1x1x32xi32>
    %36 = arith.cmpi ne, %34, %35 : vector<1x1x32xi32>
    %c0_i32_19 = arith.constant 0 : i32
    %37 = vector.broadcast %c0_i32_19 : i32 to vector<1x1x32xi32>
    %38 = arith.cmpi slt, %34, %37 : vector<1x1x32xi32>
    %c0_i32_20 = arith.constant 0 : i32
    %39 = arith.cmpi slt, %32, %c0_i32_20 : i32
    %40 = vector.broadcast %39 : i1 to vector<1x1x32xi1>
    %41 = vector.broadcast %40 : vector<1x1x32xi1> to vector<1x1x32xi1>
    %42 = arith.xori %38, %41 : vector<1x1x32xi1>
    %43 = arith.andi %42, %36 : vector<1x1x32xi1>
    %44 = vector.broadcast %32 : i32 to vector<1x1x32xi32>
    %45 = arith.addi %34, %44 : vector<1x1x32xi32>
    %46 = arith.select %43, %45, %34 : vector<1x1x32xi1>, vector<1x1x32xi32>
    %c0_i32_21 = arith.constant 0 : i32
    %47 = vector.broadcast %c0_i32_21 : i32 to vector<1x1x32xi32>
    %48 = arith.cmpi eq, %46, %47 : vector<1x1x32xi32>
    %cst_22 = arith.constant 1.875000e-01 : f32
    %49 = vector.broadcast %cst_22 : f32 to vector<1x1x32xf32>
    %50 = arith.select %48, %49, %28 : vector<1x1x32xi1>, vector<1x1x32xf32>
    %51 = vector.broadcast %50 : vector<1x1x32xf32> to vector<8x16x32xf32>
    %52 = arith.mulf %5, %51 : vector<8x16x32xf32>
    %c0_23 = arith.constant 0 : index
    %c0_24 = arith.constant 0 : index
    %c0_25 = arith.constant 0 : index
    %c0_26 = arith.constant 0 : index
    %c2 = arith.constant 2 : index
    %53 = vector.load %arg2[%c0_23, %c0_24, %c0_25, %c0_26, %c2] : memref<1x1x8x18x35xf32, #tpu.memory_space<vmem>>, vector<1x1x8x16x32xf32>
    %54 = vector.shape_cast %53 : vector<1x1x8x16x32xf32> to vector<8x16x32xf32>
    %c0_27 = arith.constant 0 : index
    %c0_28 = arith.constant 0 : index
    %c0_29 = arith.constant 0 : index
    %c0_30 = arith.constant 0 : index
    %c3 = arith.constant 3 : index
    %55 = vector.load %arg2[%c0_27, %c0_28, %c0_29, %c0_30, %c3] : memref<1x1x8x18x35xf32, #tpu.memory_space<vmem>>, vector<1x1x8x16x32xf32>
    %56 = vector.shape_cast %55 : vector<1x1x8x16x32xf32> to vector<8x16x32xf32>
    %57 = arith.addf %54, %56 : vector<8x16x32xf32>
    %cst_31 = arith.constant 0.000000e+00 : f32
    %58 = vector.broadcast %cst_31 : f32 to vector<1x1x32xf32>
    %c0_i32_32 = arith.constant 0 : i32
    %59 = vector.broadcast %c0_i32_32 : i32 to vector<1x1x32xi32>
    %60 = arith.addi %0, %59 : vector<1x1x32xi32>
    %c2_i32_33 = arith.constant 2 : i32
    %c0_i32_34 = arith.constant 0 : i32
    %61 = arith.cmpi eq, %c2_i32_33, %c0_i32_34 : i32
    %c1_i32_35 = arith.constant 1 : i32
    %62 = arith.select %61, %c1_i32_35, %c2_i32_33 : i32
    %63 = vector.broadcast %62 : i32 to vector<1x1x32xi32>
    %64 = arith.remsi %60, %63 : vector<1x1x32xi32>
    %c0_i32_36 = arith.constant 0 : i32
    %65 = vector.broadcast %c0_i32_36 : i32 to vector<1x1x32xi32>
    %66 = arith.cmpi ne, %64, %65 : vector<1x1x32xi32>
    %c0_i32_37 = arith.constant 0 : i32
    %67 = vector.broadcast %c0_i32_37 : i32 to vector<1x1x32xi32>
    %68 = arith.cmpi slt, %64, %67 : vector<1x1x32xi32>
    %c0_i32_38 = arith.constant 0 : i32
    %69 = arith.cmpi slt, %62, %c0_i32_38 : i32
    %70 = vector.broadcast %69 : i1 to vector<1x1x32xi1>
    %71 = vector.broadcast %70 : vector<1x1x32xi1> to vector<1x1x32xi1>
    %72 = arith.xori %68, %71 : vector<1x1x32xi1>
    %73 = arith.andi %72, %66 : vector<1x1x32xi1>
    %74 = vector.broadcast %62 : i32 to vector<1x1x32xi32>
    %75 = arith.addi %64, %74 : vector<1x1x32xi32>
    %76 = arith.select %73, %75, %64 : vector<1x1x32xi1>, vector<1x1x32xi32>
    %c0_i32_39 = arith.constant 0 : i32
    %77 = vector.broadcast %c0_i32_39 : i32 to vector<1x1x32xi32>
    %78 = arith.cmpi eq, %76, %77 : vector<1x1x32xi32>
    %cst_40 = arith.constant 1.875000e-01 : f32
    %79 = vector.broadcast %cst_40 : f32 to vector<1x1x32xf32>
    %80 = arith.select %78, %79, %58 : vector<1x1x32xi1>, vector<1x1x32xf32>
    %c1_i32_41 = arith.constant 1 : i32
    %81 = vector.broadcast %c1_i32_41 : i32 to vector<1x1x32xi32>
    %82 = arith.addi %0, %81 : vector<1x1x32xi32>
    %c2_i32_42 = arith.constant 2 : i32
    %c0_i32_43 = arith.constant 0 : i32
    %83 = arith.cmpi eq, %c2_i32_42, %c0_i32_43 : i32
    %c1_i32_44 = arith.constant 1 : i32
    %84 = arith.select %83, %c1_i32_44, %c2_i32_42 : i32
    %85 = vector.broadcast %84 : i32 to vector<1x1x32xi32>
    %86 = arith.remsi %82, %85 : vector<1x1x32xi32>
    %c0_i32_45 = arith.constant 0 : i32
    %87 = vector.broadcast %c0_i32_45 : i32 to vector<1x1x32xi32>
    %88 = arith.cmpi ne, %86, %87 : vector<1x1x32xi32>
    %c0_i32_46 = arith.constant 0 : i32
    %89 = vector.broadcast %c0_i32_46 : i32 to vector<1x1x32xi32>
    %90 = arith.cmpi slt, %86, %89 : vector<1x1x32xi32>
    %c0_i32_47 = arith.constant 0 : i32
    %91 = arith.cmpi slt, %84, %c0_i32_47 : i32
    %92 = vector.broadcast %91 : i1 to vector<1x1x32xi1>
    %93 = vector.broadcast %92 : vector<1x1x32xi1> to vector<1x1x32xi1>
    %94 = arith.xori %90, %93 : vector<1x1x32xi1>
    %95 = arith.andi %94, %88 : vector<1x1x32xi1>
    %96 = vector.broadcast %84 : i32 to vector<1x1x32xi32>
    %97 = arith.addi %86, %96 : vector<1x1x32xi32>
    %98 = arith.select %95, %97, %86 : vector<1x1x32xi1>, vector<1x1x32xi32>
    %c0_i32_48 = arith.constant 0 : i32
    %99 = vector.broadcast %c0_i32_48 : i32 to vector<1x1x32xi32>
    %100 = arith.cmpi eq, %98, %99 : vector<1x1x32xi32>
    %cst_49 = arith.constant 6.250000e-02 : f32
    %101 = vector.broadcast %cst_49 : f32 to vector<1x1x32xf32>
    %102 = arith.select %100, %101, %80 : vector<1x1x32xi1>, vector<1x1x32xf32>
    %103 = vector.broadcast %102 : vector<1x1x32xf32> to vector<8x16x32xf32>
    %104 = arith.mulf %57, %103 : vector<8x16x32xf32>
    %105 = arith.addf %52, %104 : vector<8x16x32xf32>
    %c0_50 = arith.constant 0 : index
    %c0_51 = arith.constant 0 : index
    %c0_52 = arith.constant 0 : index
    %c1_53 = arith.constant 1 : index
    %c0_54 = arith.constant 0 : index
    %106 = vector.load %arg2[%c0_50, %c0_51, %c0_52, %c1_53, %c0_54] : memref<1x1x8x18x35xf32, #tpu.memory_space<vmem>>, vector<1x1x8x16x32xf32>
    %107 = vector.shape_cast %106 : vector<1x1x8x16x32xf32> to vector<8x16x32xf32>
    %c0_55 = arith.constant 0 : index
    %c0_56 = arith.constant 0 : index
    %c0_57 = arith.constant 0 : index
    %c1_58 = arith.constant 1 : index
    %c1_59 = arith.constant 1 : index
    %108 = vector.load %arg2[%c0_55, %c0_56, %c0_57, %c1_58, %c1_59] : memref<1x1x8x18x35xf32, #tpu.memory_space<vmem>>, vector<1x1x8x16x32xf32>
    %109 = vector.shape_cast %108 : vector<1x1x8x16x32xf32> to vector<8x16x32xf32>
    %110 = arith.addf %107, %109 : vector<8x16x32xf32>
    %cst_60 = arith.constant 0.000000e+00 : f32
    %111 = vector.broadcast %cst_60 : f32 to vector<1x1x32xf32>
    %c0_i32_61 = arith.constant 0 : i32
    %112 = vector.broadcast %c0_i32_61 : i32 to vector<1x1x32xi32>
    %113 = arith.addi %0, %112 : vector<1x1x32xi32>
    %c2_i32_62 = arith.constant 2 : i32
    %c0_i32_63 = arith.constant 0 : i32
    %114 = arith.cmpi eq, %c2_i32_62, %c0_i32_63 : i32
    %c1_i32_64 = arith.constant 1 : i32
    %115 = arith.select %114, %c1_i32_64, %c2_i32_62 : i32
    %116 = vector.broadcast %115 : i32 to vector<1x1x32xi32>
    %117 = arith.remsi %113, %116 : vector<1x1x32xi32>
    %c0_i32_65 = arith.constant 0 : i32
    %118 = vector.broadcast %c0_i32_65 : i32 to vector<1x1x32xi32>
    %119 = arith.cmpi ne, %117, %118 : vector<1x1x32xi32>
    %c0_i32_66 = arith.constant 0 : i32
    %120 = vector.broadcast %c0_i32_66 : i32 to vector<1x1x32xi32>
    %121 = arith.cmpi slt, %117, %120 : vector<1x1x32xi32>
    %c0_i32_67 = arith.constant 0 : i32
    %122 = arith.cmpi slt, %115, %c0_i32_67 : i32
    %123 = vector.broadcast %122 : i1 to vector<1x1x32xi1>
    %124 = vector.broadcast %123 : vector<1x1x32xi1> to vector<1x1x32xi1>
    %125 = arith.xori %121, %124 : vector<1x1x32xi1>
    %126 = arith.andi %125, %119 : vector<1x1x32xi1>
    %127 = vector.broadcast %115 : i32 to vector<1x1x32xi32>
    %128 = arith.addi %117, %127 : vector<1x1x32xi32>
    %129 = arith.select %126, %128, %117 : vector<1x1x32xi1>, vector<1x1x32xi32>
    %c0_i32_68 = arith.constant 0 : i32
    %130 = vector.broadcast %c0_i32_68 : i32 to vector<1x1x32xi32>
    %131 = arith.cmpi eq, %129, %130 : vector<1x1x32xi32>
    %cst_69 = arith.constant 1.875000e-01 : f32
    %132 = vector.broadcast %cst_69 : f32 to vector<1x1x32xf32>
    %133 = arith.select %131, %132, %111 : vector<1x1x32xi1>, vector<1x1x32xf32>
    %c1_i32_70 = arith.constant 1 : i32
    %134 = vector.broadcast %c1_i32_70 : i32 to vector<1x1x32xi32>
    %135 = arith.addi %0, %134 : vector<1x1x32xi32>
    %c2_i32_71 = arith.constant 2 : i32
    %c0_i32_72 = arith.constant 0 : i32
    %136 = arith.cmpi eq, %c2_i32_71, %c0_i32_72 : i32
    %c1_i32_73 = arith.constant 1 : i32
    %137 = arith.select %136, %c1_i32_73, %c2_i32_71 : i32
    %138 = vector.broadcast %137 : i32 to vector<1x1x32xi32>
    %139 = arith.remsi %135, %138 : vector<1x1x32xi32>
    %c0_i32_74 = arith.constant 0 : i32
    %140 = vector.broadcast %c0_i32_74 : i32 to vector<1x1x32xi32>
    %141 = arith.cmpi ne, %139, %140 : vector<1x1x32xi32>
    %c0_i32_75 = arith.constant 0 : i32
    %142 = vector.broadcast %c0_i32_75 : i32 to vector<1x1x32xi32>
    %143 = arith.cmpi slt, %139, %142 : vector<1x1x32xi32>
    %c0_i32_76 = arith.constant 0 : i32
    %144 = arith.cmpi slt, %137, %c0_i32_76 : i32
    %145 = vector.broadcast %144 : i1 to vector<1x1x32xi1>
    %146 = vector.broadcast %145 : vector<1x1x32xi1> to vector<1x1x32xi1>
    %147 = arith.xori %143, %146 : vector<1x1x32xi1>
    %148 = arith.andi %147, %141 : vector<1x1x32xi1>
    %149 = vector.broadcast %137 : i32 to vector<1x1x32xi32>
    %150 = arith.addi %139, %149 : vector<1x1x32xi32>
    %151 = arith.select %148, %150, %139 : vector<1x1x32xi1>, vector<1x1x32xi32>
    %c0_i32_77 = arith.constant 0 : i32
    %152 = vector.broadcast %c0_i32_77 : i32 to vector<1x1x32xi32>
    %153 = arith.cmpi eq, %151, %152 : vector<1x1x32xi32>
    %cst_78 = arith.constant 5.625000e-01 : f32
    %154 = vector.broadcast %cst_78 : f32 to vector<1x1x32xf32>
    %155 = arith.select %153, %154, %133 : vector<1x1x32xi1>, vector<1x1x32xf32>
    %156 = vector.broadcast %155 : vector<1x1x32xf32> to vector<8x16x32xf32>
    %157 = arith.mulf %110, %156 : vector<8x16x32xf32>
    %158 = arith.addf %105, %157 : vector<8x16x32xf32>
    %cst_79 = arith.constant 0.000000e+00 : f32
    %159 = vector.broadcast %cst_79 : f32 to vector<1x1x32xf32>
    %c0_i32_80 = arith.constant 0 : i32
    %160 = vector.broadcast %c0_i32_80 : i32 to vector<1x1x32xi32>
    %161 = arith.addi %0, %160 : vector<1x1x32xi32>
    %c2_i32_81 = arith.constant 2 : i32
    %c0_i32_82 = arith.constant 0 : i32
    %162 = arith.cmpi eq, %c2_i32_81, %c0_i32_82 : i32
    %c1_i32_83 = arith.constant 1 : i32
    %163 = arith.select %162, %c1_i32_83, %c2_i32_81 : i32
    %164 = vector.broadcast %163 : i32 to vector<1x1x32xi32>
    %165 = arith.remsi %161, %164 : vector<1x1x32xi32>
    %c0_i32_84 = arith.constant 0 : i32
    %166 = vector.broadcast %c0_i32_84 : i32 to vector<1x1x32xi32>
    %167 = arith.cmpi ne, %165, %166 : vector<1x1x32xi32>
    %c0_i32_85 = arith.constant 0 : i32
    %168 = vector.broadcast %c0_i32_85 : i32 to vector<1x1x32xi32>
    %169 = arith.cmpi slt, %165, %168 : vector<1x1x32xi32>
    %c0_i32_86 = arith.constant 0 : i32
    %170 = arith.cmpi slt, %163, %c0_i32_86 : i32
    %171 = vector.broadcast %170 : i1 to vector<1x1x32xi1>
    %172 = vector.broadcast %171 : vector<1x1x32xi1> to vector<1x1x32xi1>
    %173 = arith.xori %169, %172 : vector<1x1x32xi1>
    %174 = arith.andi %173, %167 : vector<1x1x32xi1>
    %175 = vector.broadcast %163 : i32 to vector<1x1x32xi32>
    %176 = arith.addi %165, %175 : vector<1x1x32xi32>
    %177 = arith.select %174, %176, %165 : vector<1x1x32xi1>, vector<1x1x32xi32>
    %c0_i32_87 = arith.constant 0 : i32
    %178 = vector.broadcast %c0_i32_87 : i32 to vector<1x1x32xi32>
    %179 = arith.cmpi eq, %177, %178 : vector<1x1x32xi32>
    %cst_88 = arith.constant 1.875000e-01 : f32
    %180 = vector.broadcast %cst_88 : f32 to vector<1x1x32xf32>
    %181 = arith.select %179, %180, %159 : vector<1x1x32xi1>, vector<1x1x32xf32>
    %c1_i32_89 = arith.constant 1 : i32
    %182 = vector.broadcast %c1_i32_89 : i32 to vector<1x1x32xi32>
    %183 = arith.addi %0, %182 : vector<1x1x32xi32>
    %c2_i32_90 = arith.constant 2 : i32
    %c0_i32_91 = arith.constant 0 : i32
    %184 = arith.cmpi eq, %c2_i32_90, %c0_i32_91 : i32
    %c1_i32_92 = arith.constant 1 : i32
    %185 = arith.select %184, %c1_i32_92, %c2_i32_90 : i32
    %186 = vector.broadcast %185 : i32 to vector<1x1x32xi32>
    %187 = arith.remsi %183, %186 : vector<1x1x32xi32>
    %c0_i32_93 = arith.constant 0 : i32
    %188 = vector.broadcast %c0_i32_93 : i32 to vector<1x1x32xi32>
    %189 = arith.cmpi ne, %187, %188 : vector<1x1x32xi32>
    %c0_i32_94 = arith.constant 0 : i32
    %190 = vector.broadcast %c0_i32_94 : i32 to vector<1x1x32xi32>
    %191 = arith.cmpi slt, %187, %190 : vector<1x1x32xi32>
    %c0_i32_95 = arith.constant 0 : i32
    %192 = arith.cmpi slt, %185, %c0_i32_95 : i32
    %193 = vector.broadcast %192 : i1 to vector<1x1x32xi1>
    %194 = vector.broadcast %193 : vector<1x1x32xi1> to vector<1x1x32xi1>
    %195 = arith.xori %191, %194 : vector<1x1x32xi1>
    %196 = arith.andi %195, %189 : vector<1x1x32xi1>
    %197 = vector.broadcast %185 : i32 to vector<1x1x32xi32>
    %198 = arith.addi %187, %197 : vector<1x1x32xi32>
    %199 = arith.select %196, %198, %187 : vector<1x1x32xi1>, vector<1x1x32xi32>
    %c0_i32_96 = arith.constant 0 : i32
    %200 = vector.broadcast %c0_i32_96 : i32 to vector<1x1x32xi32>
    %201 = arith.cmpi eq, %199, %200 : vector<1x1x32xi32>
    %cst_97 = arith.constant 5.625000e-01 : f32
    %202 = vector.broadcast %cst_97 : f32 to vector<1x1x32xf32>
    %203 = arith.select %201, %202, %181 : vector<1x1x32xi1>, vector<1x1x32xf32>
    %204 = vector.broadcast %203 : vector<1x1x32xf32> to vector<8x16x32xf32>
    %205 = arith.mulf %110, %204 : vector<8x16x32xf32>
    %c0_98 = arith.constant 0 : index
    %c0_99 = arith.constant 0 : index
    %c0_100 = arith.constant 0 : index
    %c1_101 = arith.constant 1 : index
    %c2_102 = arith.constant 2 : index
    %206 = vector.load %arg2[%c0_98, %c0_99, %c0_100, %c1_101, %c2_102] : memref<1x1x8x18x35xf32, #tpu.memory_space<vmem>>, vector<1x1x8x16x32xf32>
    %207 = vector.shape_cast %206 : vector<1x1x8x16x32xf32> to vector<8x16x32xf32>
    %c0_103 = arith.constant 0 : index
    %c0_104 = arith.constant 0 : index
    %c0_105 = arith.constant 0 : index
    %c1_106 = arith.constant 1 : index
    %c3_107 = arith.constant 3 : index
    %208 = vector.load %arg2[%c0_103, %c0_104, %c0_105, %c1_106, %c3_107] : memref<1x1x8x18x35xf32, #tpu.memory_space<vmem>>, vector<1x1x8x16x32xf32>
    %209 = vector.shape_cast %208 : vector<1x1x8x16x32xf32> to vector<8x16x32xf32>
    %210 = arith.addf %207, %209 : vector<8x16x32xf32>
    %cst_108 = arith.constant 0.000000e+00 : f32
    %211 = vector.broadcast %cst_108 : f32 to vector<1x1x32xf32>
    %c0_i32_109 = arith.constant 0 : i32
    %212 = vector.broadcast %c0_i32_109 : i32 to vector<1x1x32xi32>
    %213 = arith.addi %0, %212 : vector<1x1x32xi32>
    %c2_i32_110 = arith.constant 2 : i32
    %c0_i32_111 = arith.constant 0 : i32
    %214 = arith.cmpi eq, %c2_i32_110, %c0_i32_111 : i32
    %c1_i32_112 = arith.constant 1 : i32
    %215 = arith.select %214, %c1_i32_112, %c2_i32_110 : i32
    %216 = vector.broadcast %215 : i32 to vector<1x1x32xi32>
    %217 = arith.remsi %213, %216 : vector<1x1x32xi32>
    %c0_i32_113 = arith.constant 0 : i32
    %218 = vector.broadcast %c0_i32_113 : i32 to vector<1x1x32xi32>
    %219 = arith.cmpi ne, %217, %218 : vector<1x1x32xi32>
    %c0_i32_114 = arith.constant 0 : i32
    %220 = vector.broadcast %c0_i32_114 : i32 to vector<1x1x32xi32>
    %221 = arith.cmpi slt, %217, %220 : vector<1x1x32xi32>
    %c0_i32_115 = arith.constant 0 : i32
    %222 = arith.cmpi slt, %215, %c0_i32_115 : i32
    %223 = vector.broadcast %222 : i1 to vector<1x1x32xi1>
    %224 = vector.broadcast %223 : vector<1x1x32xi1> to vector<1x1x32xi1>
    %225 = arith.xori %221, %224 : vector<1x1x32xi1>
    %226 = arith.andi %225, %219 : vector<1x1x32xi1>
    %227 = vector.broadcast %215 : i32 to vector<1x1x32xi32>
    %228 = arith.addi %217, %227 : vector<1x1x32xi32>
    %229 = arith.select %226, %228, %217 : vector<1x1x32xi1>, vector<1x1x32xi32>
    %c0_i32_116 = arith.constant 0 : i32
    %230 = vector.broadcast %c0_i32_116 : i32 to vector<1x1x32xi32>
    %231 = arith.cmpi eq, %229, %230 : vector<1x1x32xi32>
    %cst_117 = arith.constant 5.625000e-01 : f32
    %232 = vector.broadcast %cst_117 : f32 to vector<1x1x32xf32>
    %233 = arith.select %231, %232, %211 : vector<1x1x32xi1>, vector<1x1x32xf32>
    %c1_i32_118 = arith.constant 1 : i32
    %234 = vector.broadcast %c1_i32_118 : i32 to vector<1x1x32xi32>
    %235 = arith.addi %0, %234 : vector<1x1x32xi32>
    %c2_i32_119 = arith.constant 2 : i32
    %c0_i32_120 = arith.constant 0 : i32
    %236 = arith.cmpi eq, %c2_i32_119, %c0_i32_120 : i32
    %c1_i32_121 = arith.constant 1 : i32
    %237 = arith.select %236, %c1_i32_121, %c2_i32_119 : i32
    %238 = vector.broadcast %237 : i32 to vector<1x1x32xi32>
    %239 = arith.remsi %235, %238 : vector<1x1x32xi32>
    %c0_i32_122 = arith.constant 0 : i32
    %240 = vector.broadcast %c0_i32_122 : i32 to vector<1x1x32xi32>
    %241 = arith.cmpi ne, %239, %240 : vector<1x1x32xi32>
    %c0_i32_123 = arith.constant 0 : i32
    %242 = vector.broadcast %c0_i32_123 : i32 to vector<1x1x32xi32>
    %243 = arith.cmpi slt, %239, %242 : vector<1x1x32xi32>
    %c0_i32_124 = arith.constant 0 : i32
    %244 = arith.cmpi slt, %237, %c0_i32_124 : i32
    %245 = vector.broadcast %244 : i1 to vector<1x1x32xi1>
    %246 = vector.broadcast %245 : vector<1x1x32xi1> to vector<1x1x32xi1>
    %247 = arith.xori %243, %246 : vector<1x1x32xi1>
    %248 = arith.andi %247, %241 : vector<1x1x32xi1>
    %249 = vector.broadcast %237 : i32 to vector<1x1x32xi32>
    %250 = arith.addi %239, %249 : vector<1x1x32xi32>
    %251 = arith.select %248, %250, %239 : vector<1x1x32xi1>, vector<1x1x32xi32>
    %c0_i32_125 = arith.constant 0 : i32
    %252 = vector.broadcast %c0_i32_125 : i32 to vector<1x1x32xi32>
    %253 = arith.cmpi eq, %251, %252 : vector<1x1x32xi32>
    %cst_126 = arith.constant 1.875000e-01 : f32
    %254 = vector.broadcast %cst_126 : f32 to vector<1x1x32xf32>
    %255 = arith.select %253, %254, %233 : vector<1x1x32xi1>, vector<1x1x32xf32>
    %256 = vector.broadcast %255 : vector<1x1x32xf32> to vector<8x16x32xf32>
    %257 = arith.mulf %210, %256 : vector<8x16x32xf32>
    %258 = arith.addf %158, %257 : vector<8x16x32xf32>
    %cst_127 = arith.constant 0.000000e+00 : f32
    %259 = vector.broadcast %cst_127 : f32 to vector<1x1x32xf32>
    %c0_i32_128 = arith.constant 0 : i32
    %260 = vector.broadcast %c0_i32_128 : i32 to vector<1x1x32xi32>
    %261 = arith.addi %0, %260 : vector<1x1x32xi32>
    %c2_i32_129 = arith.constant 2 : i32
    %c0_i32_130 = arith.constant 0 : i32
    %262 = arith.cmpi eq, %c2_i32_129, %c0_i32_130 : i32
    %c1_i32_131 = arith.constant 1 : i32
    %263 = arith.select %262, %c1_i32_131, %c2_i32_129 : i32
    %264 = vector.broadcast %263 : i32 to vector<1x1x32xi32>
    %265 = arith.remsi %261, %264 : vector<1x1x32xi32>
    %c0_i32_132 = arith.constant 0 : i32
    %266 = vector.broadcast %c0_i32_132 : i32 to vector<1x1x32xi32>
    %267 = arith.cmpi ne, %265, %266 : vector<1x1x32xi32>
    %c0_i32_133 = arith.constant 0 : i32
    %268 = vector.broadcast %c0_i32_133 : i32 to vector<1x1x32xi32>
    %269 = arith.cmpi slt, %265, %268 : vector<1x1x32xi32>
    %c0_i32_134 = arith.constant 0 : i32
    %270 = arith.cmpi slt, %263, %c0_i32_134 : i32
    %271 = vector.broadcast %270 : i1 to vector<1x1x32xi1>
    %272 = vector.broadcast %271 : vector<1x1x32xi1> to vector<1x1x32xi1>
    %273 = arith.xori %269, %272 : vector<1x1x32xi1>
    %274 = arith.andi %273, %267 : vector<1x1x32xi1>
    %275 = vector.broadcast %263 : i32 to vector<1x1x32xi32>
    %276 = arith.addi %265, %275 : vector<1x1x32xi32>
    %277 = arith.select %274, %276, %265 : vector<1x1x32xi1>, vector<1x1x32xi32>
    %c0_i32_135 = arith.constant 0 : i32
    %278 = vector.broadcast %c0_i32_135 : i32 to vector<1x1x32xi32>
    %279 = arith.cmpi eq, %277, %278 : vector<1x1x32xi32>
    %cst_136 = arith.constant 5.625000e-01 : f32
    %280 = vector.broadcast %cst_136 : f32 to vector<1x1x32xf32>
    %281 = arith.select %279, %280, %259 : vector<1x1x32xi1>, vector<1x1x32xf32>
    %c1_i32_137 = arith.constant 1 : i32
    %282 = vector.broadcast %c1_i32_137 : i32 to vector<1x1x32xi32>
    %283 = arith.addi %0, %282 : vector<1x1x32xi32>
    %c2_i32_138 = arith.constant 2 : i32
    %c0_i32_139 = arith.constant 0 : i32
    %284 = arith.cmpi eq, %c2_i32_138, %c0_i32_139 : i32
    %c1_i32_140 = arith.constant 1 : i32
    %285 = arith.select %284, %c1_i32_140, %c2_i32_138 : i32
    %286 = vector.broadcast %285 : i32 to vector<1x1x32xi32>
    %287 = arith.remsi %283, %286 : vector<1x1x32xi32>
    %c0_i32_141 = arith.constant 0 : i32
    %288 = vector.broadcast %c0_i32_141 : i32 to vector<1x1x32xi32>
    %289 = arith.cmpi ne, %287, %288 : vector<1x1x32xi32>
    %c0_i32_142 = arith.constant 0 : i32
    %290 = vector.broadcast %c0_i32_142 : i32 to vector<1x1x32xi32>
    %291 = arith.cmpi slt, %287, %290 : vector<1x1x32xi32>
    %c0_i32_143 = arith.constant 0 : i32
    %292 = arith.cmpi slt, %285, %c0_i32_143 : i32
    %293 = vector.broadcast %292 : i1 to vector<1x1x32xi1>
    %294 = vector.broadcast %293 : vector<1x1x32xi1> to vector<1x1x32xi1>
    %295 = arith.xori %291, %294 : vector<1x1x32xi1>
    %296 = arith.andi %295, %289 : vector<1x1x32xi1>
    %297 = vector.broadcast %285 : i32 to vector<1x1x32xi32>
    %298 = arith.addi %287, %297 : vector<1x1x32xi32>
    %299 = arith.select %296, %298, %287 : vector<1x1x32xi1>, vector<1x1x32xi32>
    %c0_i32_144 = arith.constant 0 : i32
    %300 = vector.broadcast %c0_i32_144 : i32 to vector<1x1x32xi32>
    %301 = arith.cmpi eq, %299, %300 : vector<1x1x32xi32>
    %cst_145 = arith.constant 1.875000e-01 : f32
    %302 = vector.broadcast %cst_145 : f32 to vector<1x1x32xf32>
    %303 = arith.select %301, %302, %281 : vector<1x1x32xi1>, vector<1x1x32xf32>
    %304 = vector.broadcast %303 : vector<1x1x32xf32> to vector<8x16x32xf32>
    %305 = arith.mulf %210, %304 : vector<8x16x32xf32>
    %306 = arith.addf %205, %305 : vector<8x16x32xf32>
    %c0_146 = arith.constant 0 : index
    %c0_147 = arith.constant 0 : index
    %c0_148 = arith.constant 0 : index
    %c2_149 = arith.constant 2 : index
    %c0_150 = arith.constant 0 : index
    %307 = vector.load %arg2[%c0_146, %c0_147, %c0_148, %c2_149, %c0_150] : memref<1x1x8x18x35xf32, #tpu.memory_space<vmem>>, vector<1x1x8x16x32xf32>
    %308 = vector.shape_cast %307 : vector<1x1x8x16x32xf32> to vector<8x16x32xf32>
    %c0_151 = arith.constant 0 : index
    %c0_152 = arith.constant 0 : index
    %c0_153 = arith.constant 0 : index
    %c2_154 = arith.constant 2 : index
    %c1_155 = arith.constant 1 : index
    %309 = vector.load %arg2[%c0_151, %c0_152, %c0_153, %c2_154, %c1_155] : memref<1x1x8x18x35xf32, #tpu.memory_space<vmem>>, vector<1x1x8x16x32xf32>
    %310 = vector.shape_cast %309 : vector<1x1x8x16x32xf32> to vector<8x16x32xf32>
    %311 = arith.addf %308, %310 : vector<8x16x32xf32>
    %cst_156 = arith.constant 0.000000e+00 : f32
    %312 = vector.broadcast %cst_156 : f32 to vector<1x1x32xf32>
    %c0_i32_157 = arith.constant 0 : i32
    %313 = vector.broadcast %c0_i32_157 : i32 to vector<1x1x32xi32>
    %314 = arith.addi %0, %313 : vector<1x1x32xi32>
    %c2_i32_158 = arith.constant 2 : i32
    %c0_i32_159 = arith.constant 0 : i32
    %315 = arith.cmpi eq, %c2_i32_158, %c0_i32_159 : i32
    %c1_i32_160 = arith.constant 1 : i32
    %316 = arith.select %315, %c1_i32_160, %c2_i32_158 : i32
    %317 = vector.broadcast %316 : i32 to vector<1x1x32xi32>
    %318 = arith.remsi %314, %317 : vector<1x1x32xi32>
    %c0_i32_161 = arith.constant 0 : i32
    %319 = vector.broadcast %c0_i32_161 : i32 to vector<1x1x32xi32>
    %320 = arith.cmpi ne, %318, %319 : vector<1x1x32xi32>
    %c0_i32_162 = arith.constant 0 : i32
    %321 = vector.broadcast %c0_i32_162 : i32 to vector<1x1x32xi32>
    %322 = arith.cmpi slt, %318, %321 : vector<1x1x32xi32>
    %c0_i32_163 = arith.constant 0 : i32
    %323 = arith.cmpi slt, %316, %c0_i32_163 : i32
    %324 = vector.broadcast %323 : i1 to vector<1x1x32xi1>
    %325 = vector.broadcast %324 : vector<1x1x32xi1> to vector<1x1x32xi1>
    %326 = arith.xori %322, %325 : vector<1x1x32xi1>
    %327 = arith.andi %326, %320 : vector<1x1x32xi1>
    %328 = vector.broadcast %316 : i32 to vector<1x1x32xi32>
    %329 = arith.addi %318, %328 : vector<1x1x32xi32>
    %330 = arith.select %327, %329, %318 : vector<1x1x32xi1>, vector<1x1x32xi32>
    %c0_i32_164 = arith.constant 0 : i32
    %331 = vector.broadcast %c0_i32_164 : i32 to vector<1x1x32xi32>
    %332 = arith.cmpi eq, %330, %331 : vector<1x1x32xi32>
    %cst_165 = arith.constant 6.250000e-02 : f32
    %333 = vector.broadcast %cst_165 : f32 to vector<1x1x32xf32>
    %334 = arith.select %332, %333, %312 : vector<1x1x32xi1>, vector<1x1x32xf32>
    %c1_i32_166 = arith.constant 1 : i32
    %335 = vector.broadcast %c1_i32_166 : i32 to vector<1x1x32xi32>
    %336 = arith.addi %0, %335 : vector<1x1x32xi32>
    %c2_i32_167 = arith.constant 2 : i32
    %c0_i32_168 = arith.constant 0 : i32
    %337 = arith.cmpi eq, %c2_i32_167, %c0_i32_168 : i32
    %c1_i32_169 = arith.constant 1 : i32
    %338 = arith.select %337, %c1_i32_169, %c2_i32_167 : i32
    %339 = vector.broadcast %338 : i32 to vector<1x1x32xi32>
    %340 = arith.remsi %336, %339 : vector<1x1x32xi32>
    %c0_i32_170 = arith.constant 0 : i32
    %341 = vector.broadcast %c0_i32_170 : i32 to vector<1x1x32xi32>
    %342 = arith.cmpi ne, %340, %341 : vector<1x1x32xi32>
    %c0_i32_171 = arith.constant 0 : i32
    %343 = vector.broadcast %c0_i32_171 : i32 to vector<1x1x32xi32>
    %344 = arith.cmpi slt, %340, %343 : vector<1x1x32xi32>
    %c0_i32_172 = arith.constant 0 : i32
    %345 = arith.cmpi slt, %338, %c0_i32_172 : i32
    %346 = vector.broadcast %345 : i1 to vector<1x1x32xi1>
    %347 = vector.broadcast %346 : vector<1x1x32xi1> to vector<1x1x32xi1>
    %348 = arith.xori %344, %347 : vector<1x1x32xi1>
    %349 = arith.andi %348, %342 : vector<1x1x32xi1>
    %350 = vector.broadcast %338 : i32 to vector<1x1x32xi32>
    %351 = arith.addi %340, %350 : vector<1x1x32xi32>
    %352 = arith.select %349, %351, %340 : vector<1x1x32xi1>, vector<1x1x32xi32>
    %c0_i32_173 = arith.constant 0 : i32
    %353 = vector.broadcast %c0_i32_173 : i32 to vector<1x1x32xi32>
    %354 = arith.cmpi eq, %352, %353 : vector<1x1x32xi32>
    %cst_174 = arith.constant 1.875000e-01 : f32
    %355 = vector.broadcast %cst_174 : f32 to vector<1x1x32xf32>
    %356 = arith.select %354, %355, %334 : vector<1x1x32xi1>, vector<1x1x32xf32>
    %357 = vector.broadcast %356 : vector<1x1x32xf32> to vector<8x16x32xf32>
    %358 = arith.mulf %311, %357 : vector<8x16x32xf32>
    %359 = arith.addf %306, %358 : vector<8x16x32xf32>
    %c0_175 = arith.constant 0 : index
    %c0_176 = arith.constant 0 : index
    %c0_177 = arith.constant 0 : index
    %c2_178 = arith.constant 2 : index
    %c2_179 = arith.constant 2 : index
    %360 = vector.load %arg2[%c0_175, %c0_176, %c0_177, %c2_178, %c2_179] : memref<1x1x8x18x35xf32, #tpu.memory_space<vmem>>, vector<1x1x8x16x32xf32>
    %361 = vector.shape_cast %360 : vector<1x1x8x16x32xf32> to vector<8x16x32xf32>
    %c0_180 = arith.constant 0 : index
    %c0_181 = arith.constant 0 : index
    %c0_182 = arith.constant 0 : index
    %c2_183 = arith.constant 2 : index
    %c3_184 = arith.constant 3 : index
    %362 = vector.load %arg2[%c0_180, %c0_181, %c0_182, %c2_183, %c3_184] : memref<1x1x8x18x35xf32, #tpu.memory_space<vmem>>, vector<1x1x8x16x32xf32>
    %363 = vector.shape_cast %362 : vector<1x1x8x16x32xf32> to vector<8x16x32xf32>
    %364 = arith.addf %361, %363 : vector<8x16x32xf32>
    %cst_185 = arith.constant 0.000000e+00 : f32
    %365 = vector.broadcast %cst_185 : f32 to vector<1x1x32xf32>
    %c0_i32_186 = arith.constant 0 : i32
    %366 = vector.broadcast %c0_i32_186 : i32 to vector<1x1x32xi32>
    %367 = arith.addi %0, %366 : vector<1x1x32xi32>
    %c2_i32_187 = arith.constant 2 : i32
    %c0_i32_188 = arith.constant 0 : i32
    %368 = arith.cmpi eq, %c2_i32_187, %c0_i32_188 : i32
    %c1_i32_189 = arith.constant 1 : i32
    %369 = arith.select %368, %c1_i32_189, %c2_i32_187 : i32
    %370 = vector.broadcast %369 : i32 to vector<1x1x32xi32>
    %371 = arith.remsi %367, %370 : vector<1x1x32xi32>
    %c0_i32_190 = arith.constant 0 : i32
    %372 = vector.broadcast %c0_i32_190 : i32 to vector<1x1x32xi32>
    %373 = arith.cmpi ne, %371, %372 : vector<1x1x32xi32>
    %c0_i32_191 = arith.constant 0 : i32
    %374 = vector.broadcast %c0_i32_191 : i32 to vector<1x1x32xi32>
    %375 = arith.cmpi slt, %371, %374 : vector<1x1x32xi32>
    %c0_i32_192 = arith.constant 0 : i32
    %376 = arith.cmpi slt, %369, %c0_i32_192 : i32
    %377 = vector.broadcast %376 : i1 to vector<1x1x32xi1>
    %378 = vector.broadcast %377 : vector<1x1x32xi1> to vector<1x1x32xi1>
    %379 = arith.xori %375, %378 : vector<1x1x32xi1>
    %380 = arith.andi %379, %373 : vector<1x1x32xi1>
    %381 = vector.broadcast %369 : i32 to vector<1x1x32xi32>
    %382 = arith.addi %371, %381 : vector<1x1x32xi32>
    %383 = arith.select %380, %382, %371 : vector<1x1x32xi1>, vector<1x1x32xi32>
    %c0_i32_193 = arith.constant 0 : i32
    %384 = vector.broadcast %c0_i32_193 : i32 to vector<1x1x32xi32>
    %385 = arith.cmpi eq, %383, %384 : vector<1x1x32xi32>
    %cst_194 = arith.constant 1.875000e-01 : f32
    %386 = vector.broadcast %cst_194 : f32 to vector<1x1x32xf32>
    %387 = arith.select %385, %386, %365 : vector<1x1x32xi1>, vector<1x1x32xf32>
    %c1_i32_195 = arith.constant 1 : i32
    %388 = vector.broadcast %c1_i32_195 : i32 to vector<1x1x32xi32>
    %389 = arith.addi %0, %388 : vector<1x1x32xi32>
    %c2_i32_196 = arith.constant 2 : i32
    %c0_i32_197 = arith.constant 0 : i32
    %390 = arith.cmpi eq, %c2_i32_196, %c0_i32_197 : i32
    %c1_i32_198 = arith.constant 1 : i32
    %391 = arith.select %390, %c1_i32_198, %c2_i32_196 : i32
    %392 = vector.broadcast %391 : i32 to vector<1x1x32xi32>
    %393 = arith.remsi %389, %392 : vector<1x1x32xi32>
    %c0_i32_199 = arith.constant 0 : i32
    %394 = vector.broadcast %c0_i32_199 : i32 to vector<1x1x32xi32>
    %395 = arith.cmpi ne, %393, %394 : vector<1x1x32xi32>
    %c0_i32_200 = arith.constant 0 : i32
    %396 = vector.broadcast %c0_i32_200 : i32 to vector<1x1x32xi32>
    %397 = arith.cmpi slt, %393, %396 : vector<1x1x32xi32>
    %c0_i32_201 = arith.constant 0 : i32
    %398 = arith.cmpi slt, %391, %c0_i32_201 : i32
    %399 = vector.broadcast %398 : i1 to vector<1x1x32xi1>
    %400 = vector.broadcast %399 : vector<1x1x32xi1> to vector<1x1x32xi1>
    %401 = arith.xori %397, %400 : vector<1x1x32xi1>
    %402 = arith.andi %401, %395 : vector<1x1x32xi1>
    %403 = vector.broadcast %391 : i32 to vector<1x1x32xi32>
    %404 = arith.addi %393, %403 : vector<1x1x32xi32>
    %405 = arith.select %402, %404, %393 : vector<1x1x32xi1>, vector<1x1x32xi32>
    %c0_i32_202 = arith.constant 0 : i32
    %406 = vector.broadcast %c0_i32_202 : i32 to vector<1x1x32xi32>
    %407 = arith.cmpi eq, %405, %406 : vector<1x1x32xi32>
    %cst_203 = arith.constant 6.250000e-02 : f32
    %408 = vector.broadcast %cst_203 : f32 to vector<1x1x32xf32>
    %409 = arith.select %407, %408, %387 : vector<1x1x32xi1>, vector<1x1x32xf32>
    %410 = vector.broadcast %409 : vector<1x1x32xf32> to vector<8x16x32xf32>
    %411 = arith.mulf %364, %410 : vector<8x16x32xf32>
    %412 = arith.addf %359, %411 : vector<8x16x32xf32>
    %c0_204 = arith.constant 0 : index
    %c0_205 = arith.constant 0 : index
    %c0_206 = arith.constant 0 : index
    %c0_207 = arith.constant 0 : index
    %413 = vector.load %arg3[%c0_204, %c0_205, %c0_206, %c0_207] : memref<1x8x16x64xf32, #tpu.memory_space<vmem>>, vector<1x8x16x32xf32>
    %414 = vector.shape_cast %413 : vector<1x8x16x32xf32> to vector<8x16x32xf32>
    %415 = vector.shape_cast %258 : vector<8x16x32xf32> to vector<1x8x16x32xf32>
    tpu.vector_store %arg3[%c0_204, %c0_205, %c0_206, %c0_207], %415 {strides = array<i32>} : memref<1x8x16x64xf32, #tpu.memory_space<vmem>>, vector<1x8x16x32xf32>,
    %c0_208 = arith.constant 0 : index
    %c0_209 = arith.constant 0 : index
    %c0_210 = arith.constant 0 : index
    %c32 = arith.constant 32 : index
    %416 = vector.load %arg3[%c0_208, %c0_209, %c0_210, %c32] : memref<1x8x16x64xf32, #tpu.memory_space<vmem>>, vector<1x8x16x32xf32>
    %417 = vector.shape_cast %416 : vector<1x8x16x32xf32> to vector<8x16x32xf32>
    %418 = vector.shape_cast %412 : vector<8x16x32xf32> to vector<1x8x16x32xf32>
    tpu.vector_store %arg3[%c0_208, %c0_209, %c0_210, %c32], %418 {strides = array<i32>} : memref<1x8x16x64xf32, #tpu.memory_space<vmem>>, vector<1x8x16x32xf32>,
    return
  }
  func.func @transform_0(%arg0: i32, %arg1: i32) -> (i32, i32, i32, i32, i32) {
    %c0_i32 = arith.constant 0 : i32
    %c0_i32_0 = arith.constant 0 : i32
    %c0_i32_1 = arith.constant 0 : i32
    %c0_i32_2 = arith.constant 0 : i32
    return %arg0, %arg1, %c0_i32, %c0_i32_0, %c0_i32_1 : i32, i32, i32, i32, i32
  }
  func.func @transform_1(%arg0: i32, %arg1: i32) -> (i32, i32, i32, i32) {
    %c0_i32 = arith.constant 0 : i32
    %c0_i32_0 = arith.constant 0 : i32
    %c0_i32_1 = arith.constant 0 : i32
    return %arg0, %c0_i32, %arg1, %c0_i32_0 : i32, i32, i32, i32
  }
}

</mosaic_0001>

<bundles_post_ra>
// kernel: tpu_custom_call.1
= control target key start
LH: loop header
LB: loop body
LE: loop exit
PB: predicated region body
PF: predicated region fallthrough
CT: control target
= control target key end

     0   :  { %v9_v2 = vlaneseq  ;;  %s874_s10 = smov 127   ;;  %v875_v12 = vmov 0.0   ;;  %s1779_s0 = inlined_call_operand.vmem [shape: f32[1,1,8,18,35], index: 0, kind: input, shape index: {}]   ;;  %s1780_s1 = inlined_call_operand.hbm [shape: f32[1,8,16,64], index: 1, kind: output, shape index: {}]  }
   0x1   :  { %v895_v0 = vld [vmem:[%s1779_s0 + $0x18] sm:$0xff]  ;;  %v900_v1 = vld [vmem:[%s1779_s0] sm:$0xff]  ;;  %v914_v4 = vld [vmem:[%s1779_s0 + $0x8] sm:$0xff] }
   0x2   :  { %47 = vrot.lane.b32.xlu1 %v895_v0, %s874_s10  ;;  %43 = vrot.lane.b32.xlu0 %v900_v1, %s874_s10  ;;  %v909_v3 = vld [vmem:[%s1779_s0 + $0x20] sm:$0xff]  ;;  %v10_v5 = vand.u32 127, %v9_v2  ;;  %v923_v8 = vld [vmem:[%s1779_s0 + $0x38] sm:$0xff] }
   0x3   :  { %v928_v9 = vld [vmem:[%s1779_s0 + $0x30] sm:$0xff]  ;;  %v962_v19 = vld [vmem:[%s1779_s0 + $0x48] sm:$0xff]  ;;  %v976_v21 = vld [vmem:[%s1779_s0 + $0x60] sm:$0xff] }
   0x4   :  { %v111_v6 = vand.u32 1, %v10_v5  ;;  %v121_v7 = vadd.s32 1, %v10_v5  ;;  %v957_v18 = vld [vmem:[%s1779_s0 + $0x50] sm:$0xff]  ;;  %v971_v20 = vld [vmem:[%s1779_s0 + $0x68] sm:$0xff] }
   0x6   :  { %49 = vrot.lane.b32.xlu1 %v909_v3, %s874_s10  ;;  %45 = vrot.lane.b32.xlu0 %v914_v4, %s874_s10  ;;  %vm930_vm0 = vcmp.eq.s32.totalorder %v111_v6, 0  ;;  %v126_v11 = vand.u32 1, %v121_v7 }
   0x7   :  { %v120_v13 = vsel %vm930_vm0, 0.0625, %v875_v12  ;;  %v152_v15 = vsel %vm930_vm0, 0.1875, %v875_v12 }
   0x8   :  { %vm936_vm1 = vcmp.eq.s32.totalorder %v126_v11, 0 }
   0x9   :  { %v948_v16 = vsel %vm936_vm1, 0.5625, %v152_v15  ;;  %v952_v17 = vsel %vm936_vm1, 0.1875, %v120_v13 }
   0xa   :  { %53 = vrot.lane.b32.xlu1 %v923_v8, %s874_s10  ;;  %51 = vrot.lane.b32.xlu0 %v928_v9, %s874_s10  ;;  %1794 = vst [vmem:[#allocation5_spill] sm:$0xff] %v952_v17 }
   0xe   :  { %57 = vrot.lane.b32.xlu1 %v957_v18, %s874_s10  ;;  %55 = vrot.lane.b32.xlu0 %v962_v19, %s874_s10 }
  0x12   :  { %61 = vrot.lane.b32.xlu1 %v971_v20, %s874_s10  ;;  %59 = vrot.lane.b32.xlu0 %v976_v21, %s874_s10 }
  0x13   :  { %6 = vsyncpa [#allocation3], 0  ;;  %v985_v22 = vld [vmem:[%s1779_s0 + $0x80] sm:$0xff]  ;;  %v990_v23 = vld [vmem:[%s1779_s0 + $0x78] sm:$0xff]  ;;  %v383_v26 = vsel %vm930_vm0, 0.5625, %v875_v12  ;;  %v153_v29 = vsel %vm936_vm1, 0.0625, %v152_v15 }
  0x14   :  { %1795 = vst [vmem:[#allocation6_spill] sm:$0xff] %v985_v22  ;;  %1796 = vst [vmem:[#allocation7_spill] sm:$0xff] %v990_v23  ;;  %v999_v24 = vld [vmem:[%s1779_s0 + $0x98] sm:$0xff]  ;;  %v1004_v25 = vld [vmem:[%s1779_s0 + $0x90] sm:$0xff]  ;;  %v384_v30 = vsel %vm936_vm1, 0.1875, %v383_v26  ;;  %s876_s13 = smov 2  }
  0x15   :  { %1797 = vst [vmem:[#allocation8_spill] sm:$0xff] %v999_v24  ;;  %1798 = vst [vmem:[#allocation9_spill] sm:$0xff] %v1004_v25  ;;  %v1015_v27 = vld [vmem:[%s1779_s0 + $0xb0] sm:$0xff]  ;;  %v1020_v28 = vld [vmem:[%s1779_s0 + $0xa8] sm:$0xff]  ;;  %v847_v31 = vpack.i.bf16 %v384_v30, %v153_v29  ;;  %vm725_vm2 = vcmask 261120   ;;  %vm806_vm3 = vcmask 523520  }
  0x16   :  { %65 = vrot.lane.b32.xlu1 %v985_v22, %s874_s10  ;;  %63 = vrot.lane.b32.xlu0 %v990_v23, %s874_s10  ;;  %1799 = vst [vmem:[#allocation10_spill] sm:$0xff] %v1020_v28  ;;  %v1033_v32 = vld [vmem:[%s1779_s0 + $0x9] sm:$0xff]  ;;  %v1040_v33 = vld [vmem:[%s1779_s0 + $0x21] sm:$0xff]  ;;  %s879_s20 = smov [#allocation2]  }
  0x17   :  { %v1045_v34 = vld [vmem:[%s1779_s0 + $0x1] sm:$0xff]  ;;  %v1054_v35 = vld [vmem:[%s1779_s0 + $0x39] sm:$0xff]  ;;  %v1068_v37 = vld [vmem:[%s1779_s0 + $0x51] sm:$0xff]  ;;  %s828_s21 = sshll.u32 %s879_s20, 4  ;;  %s829_s21 = int_to_ptr.vmem [resolvable:$true] %s828_s21 }
  0x18   :  { %v1059_v36 = vld [vmem:[%s1779_s0 + $0x19] sm:$0xff]  ;;  %v1073_v38 = vld [vmem:[%s1779_s0 + $0x31] sm:$0xff]  ;;  %v1082_v39 = vld [vmem:[%s1779_s0 + $0x69] sm:$0xff]  ;;  %s852_s22 = scalar_lea.vmem %s829_s21, 2048  ;;  %p857_p1 = scmp.lt.s32.totalorder %s829_s21, %s829_s21 }
  0x19   :  { %v1087_v40 = vld [vmem:[%s1779_s0 + $0x49] sm:$0xff]  ;;  %v1096_v41 = vld [vmem:[%s1779_s0 + $0x81] sm:$0xff]  ;;  %v1110_v43 = vld [vmem:[%s1779_s0 + $0x99] sm:$0xff]  ;;  %p853_p0 = scmp.ne.s32.totalorder %s829_s21, %s852_s22  ;;  %p858_p2 = scmp.lt.s32.totalorder %s852_s22, %s852_s22 }
  0x1a   :  { %69 = vrot.lane.b32.xlu1 %v999_v24, %s874_s10  ;;  %67 = vrot.lane.b32.xlu0 %v1004_v25, %s874_s10  ;;  %v1101_v42 = vld [vmem:[%s1779_s0 + $0x61] sm:$0xff]  ;;  %v1115_v44 = vld [vmem:[%s1779_s0 + $0x79] sm:$0xff] }
  0x1b   :  { %v1124_v45 = vld [vmem:[%s1779_s0 + $0xb1] sm:$0xff]  ;;  %v1143_v48 = vld [vmem:[%s1779_s0 + $0xa9] sm:$0xff]  ;;  %v1166_v51 = vld [vmem:[%s1779_s0 + $0x3a] sm:$0xff]  ;;  %p859_p3 = por %p858_p2, %p857_p1 }
  0x1c   :  { %v1129_v46 = vld [vmem:[%s1779_s0 + $0x91] sm:$0xff]  ;;  %v1152_v49 = vld [vmem:[%s1779_s0 + $0x22] sm:$0xff]  ;;  %v1171_v52 = vld [vmem:[%s1779_s0 + $0x1a] sm:$0xff] }
  0x1d   :  { %v1138_v47 = vld [vmem:[%s1779_s0 + $0xa] sm:$0xff]  ;;  %v1157_v50 = vld [vmem:[%s1779_s0 + $0x2] sm:$0xff]  ;;  %v1180_v53 = vld [vmem:[%s1779_s0 + $0x52] sm:$0xff]  ;;  %p860_p4 = pnand %p859_p3, %p853_p0 }
  0x1e   :  { %73 = vrot.lane.b32.xlu1 %v1015_v27, %s874_s10  ;;  %71 = vrot.lane.b32.xlu0 %v1020_v28, %s874_s10  ;;  %v1185_v54 = vld [vmem:[%s1779_s0 + $0x32] sm:$0xff]  ;;  %v1194_v55 = vld [vmem:[%s1779_s0 + $0x6a] sm:$0xff] }
  0x1f   :  { %v1199_v56 = vld [vmem:[%s1779_s0 + $0x4a] sm:$0xff]  ;;  %v1208_v57 = vld [vmem:[%s1779_s0 + $0x82] sm:$0xff]  ;;  %v1222_v59 = vld [vmem:[%s1779_s0 + $0x9a] sm:$0xff] }
  0x20   :  { %v1213_v58 = vld [vmem:[%s1779_s0 + $0x62] sm:$0xff]  ;;  %v1227_v60 = vld [vmem:[%s1779_s0 + $0x7a] sm:$0xff]  ;;  %v1236_v61 = vld [vmem:[%s1779_s0 + $0xb2] sm:$0xff] }
  0x21   :  { %v1241_v62 = vld [vmem:[%s1779_s0 + $0x92] sm:$0xff]  ;;  %v1250_v63 = vld [vmem:[%s1779_s0 + $0xaa] sm:$0xff]  ;;  %s877_s0 = smov 126  }
  0x22   :  { %288 = vrot.lane.b32.xlu1 %v1033_v32, %s874_s10  ;;  %848 = vrot.lane.b32.xlu0 %v847_v31, %s876_s13 }
  0x26   :  { %292 = vrot.lane.b32.xlu1 %v1040_v33, %s874_s10  ;;  %286 = vrot.lane.b32.xlu0 %v1045_v34, %s874_s10 }
  0x2a   :  { %296 = vrot.lane.b32.xlu1 %v1054_v35, %s874_s10  ;;  %290 = vrot.lane.b32.xlu0 %v1059_v36, %s874_s10 }
  0x2e   :  { %300 = vrot.lane.b32.xlu1 %v1068_v37, %s874_s10  ;;  %294 = vrot.lane.b32.xlu0 %v1073_v38, %s874_s10 }
  0x32   :  { %304 = vrot.lane.b32.xlu1 %v1082_v39, %s874_s10  ;;  %298 = vrot.lane.b32.xlu0 %v1087_v40, %s874_s10 }
  0x36   :  { %308 = vrot.lane.b32.xlu1 %v1096_v41, %s874_s10  ;;  %302 = vrot.lane.b32.xlu0 %v1101_v42, %s874_s10 }
  0x3a   :  { %312 = vrot.lane.b32.xlu1 %v1110_v43, %s874_s10  ;;  %306 = vrot.lane.b32.xlu0 %v1115_v44, %s874_s10 }
  0x3e   :  { %316 = vrot.lane.b32.xlu1 %v1124_v45, %s874_s10  ;;  %310 = vrot.lane.b32.xlu0 %v1129_v46, %s874_s10 }
  0x42   :  { %535 = vrot.lane.b32.xlu1 %v1138_v47, %s874_s10  ;;  %314 = vrot.lane.b32.xlu0 %v1143_v48, %s874_s10 }
  0x46   :  { %539 = vrot.lane.b32.xlu1 %v1152_v49, %s874_s10  ;;  %533 = vrot.lane.b32.xlu0 %v1157_v50, %s874_s10 }
  0x4a   :  { %543 = vrot.lane.b32.xlu1 %v1166_v51, %s874_s10  ;;  %537 = vrot.lane.b32.xlu0 %v1171_v52, %s874_s10 }
  0x4e   :  { %547 = vrot.lane.b32.xlu1 %v1180_v53, %s874_s10  ;;  %541 = vrot.lane.b32.xlu0 %v1185_v54, %s874_s10 }
  0x52   :  { %551 = vrot.lane.b32.xlu1 %v1194_v55, %s874_s10  ;;  %545 = vrot.lane.b32.xlu0 %v1199_v56, %s874_s10 }
  0x56   :  { %555 = vrot.lane.b32.xlu1 %v1208_v57, %s874_s10  ;;  %549 = vrot.lane.b32.xlu0 %v1213_v58, %s874_s10 }
  0x5a   :  { %559 = vrot.lane.b32.xlu1 %v1222_v59, %s874_s10  ;;  %553 = vrot.lane.b32.xlu0 %v1227_v60, %s874_s10 }
  0x5e   :  { %563 = vrot.lane.b32.xlu1 %v1236_v61, %s874_s10  ;;  %557 = vrot.lane.b32.xlu0 %v1241_v62, %s874_s10 }
  0x62   :  { %561 = vrot.lane.b32.xlu0 %v1250_v63, %s874_s10  ;;  %s878_s10 = smov 32  }
  0x74   :  { %v48_v2 = vpop.permute.xlu1 %47  ;;  %v44_v5 = vpop.permute.xlu0 %43 }
  0x75   :  { %v1275_v23 = vadd.f32 %v44_v5, %v900_v1 }
  0x78   :  { %v50_v6 = vpop.permute.xlu1 %49  ;;  %v46_v7 = vpop.permute.xlu0 %45 }
  0x79   :  { %v1278_v22 = vadd.f32 %v46_v7, %v914_v4  ;;  %v1294_v4 = vadd.f32 %v50_v6, %v909_v3 }
  0x7c   :  { %v1254_v10 = vpop.permute.xlu1 %53  ;;  %v52_v11 = vpop.permute.xlu0 %51 }
  0x80   :  { %v1256_v12 = vpop.permute.xlu1 %57  ;;  %v1258_v13 = vpop.permute.xlu0 %55 }
  0x84   :  { %v1260_v14 = vpop.permute.xlu1 %61  ;;  %v1262_v15 = vpop.permute.xlu0 %59 }
  0x85   :  { %1800 = vst [vmem:[#allocation11_spill] sm:$0xff] %v1262_v15 }
  0x88   :  { %v1264_v26 = vpop.permute.xlu1 %65  ;;  %v1266_v29 = vpop.permute.xlu0 %63 }
  0x89   :  { %1801 = vst [vmem:[#allocation12_spill] sm:$0xff] %v1264_v26  ;;  %1802 = vst [vmem:[#allocation13_spill] sm:$0xff] %v1266_v29 }
  0x8c   :  { %v1268_v30 = vpop.permute.xlu1 %69  ;;  %v1270_v31 = vpop.permute.xlu0 %67 }
  0x8d   :  { %1803 = vst [vmem:[#allocation14_spill] sm:$0xff] %v1268_v30  ;;  %1804 = vst [vmem:[#allocation15_spill] sm:$0xff] %v1270_v31 }
  0x90   :  { %v74_v17 = vpop.permute.xlu1 %73  ;;  %v1272_v28 = vpop.permute.xlu0 %71 }
  0x91   :  { %1805 = vst [vmem:[#allocation16_spill] sm:$0xff] %v1272_v28  ;;  %v1284_v29 = vadd.f32 %v74_v17, %v1015_v27  ;;  %v1298_v17 = vadd.f32 %v48_v2, %v895_v0 }
  0x93   :  { %1806 = vst [vmem:[#allocation17_spill] sm:$0xff] %v1284_v29 }
  0x94   :  { %v289_v25 = vpop.permute.xlu1 %288  ;;  %v849_v24 = vpop.permute.xlu0 %848 }
  0x95   :  { %v335_v15 = vadd.f32 %v289_v25, %v1033_v32  ;;  %v1281_v26 = vunpack.i.l.bf16 %v849_v24  ;;  %v1311_v0 = vunpack.i.h.bf16 %v849_v24 }
  0x97   :  { %v1287_v31 = vmul.f32 %v948_v16, %v335_v15  ;;  %v158_v28 = vmul.f32 %v1281_v26, %v1275_v23  ;;  %v159_v1 = vmul.f32 %v1281_v26, %v1278_v22  ;;  %v161_v25 = vmul.f32 %v1281_v26, %v1294_v4 }
  0x98   :  { %v293_v5 = vpop.permute.xlu1 %292  ;;  %v287_v30 = vpop.permute.xlu0 %286  ;;  %v1305_v27 = vmul.f32 %v1281_v26, %v1284_v29  ;;  %v160_v6 = vmul.f32 %v1281_v26, %v1298_v17  ;;  %v1321_v29 = vadd.f32 %v52_v11, %v928_v9 }
  0x99   :  { %192 = vrot.lane.b32.xlu0 %v159_v1, %s877_s0  ;;  %190 = vrot.lane.b32.xlu1 %v158_v28, %s877_s0  ;;  %v337_v32 = vadd.f32 %v293_v5, %v1040_v33  ;;  %v334_v3 = vadd.f32 %v287_v30, %v1045_v34 }
  0x9a   :  { %v162_v30 = vmul.f32 %v1281_v26, %v1321_v29 }
  0x9b   :  { %v1314_v28 = vmul.f32 %v948_v16, %v337_v32  ;;  %v1317_v2 = vmul.f32 %v948_v16, %v334_v3  ;;  %v389_v24 = vmul.f32 %v1311_v0, %v334_v3 }
  0x9c   :  { %v297_v7 = vpop.permute.xlu1 %296  ;;  %v291_v1 = vpop.permute.xlu0 %290 }
  0x9d   :  { %1807 = vst [vmem:[#allocation18_spill] sm:$0xff] %v1314_v28  ;;  %196 = vrot.lane.b32.xlu0 %v161_v25, %s877_s0  ;;  %v339_v33 = vadd.f32 %v297_v7, %v1054_v35  ;;  %v336_v34 = vadd.f32 %v291_v1, %v1059_v36  ;;  %194 = vrot.lane.b32.xlu1 %v160_v6, %s877_s0 }
  0x9f   :  { %v1330_v5 = vmul.f32 %v948_v16, %v339_v33  ;;  %v1333_v28 = vmul.f32 %v948_v16, %v336_v34  ;;  %v391_v36 = vmul.f32 %v1311_v0, %v336_v34 }
  0xa0   :  { %v301_v25 = vpop.permute.xlu1 %300  ;;  %v295_v9 = vpop.permute.xlu0 %294 }
  0xa1   :  { %1808 = vst [vmem:[#allocation19_spill] sm:$0xff] %v1330_v5  ;;  %v341_v11 = vadd.f32 %v301_v25, %v1068_v37  ;;  %v338_v35 = vadd.f32 %v295_v9, %v1073_v38  ;;  %421 = vrot.lane.b32.xlu0 %v389_v24, %s877_s0  ;;  %198 = vrot.lane.b32.xlu1 %v162_v30, %s877_s0 }
  0xa2   :  { %v390_v5 = vmul.f32 %v1311_v0, %v335_v15  ;;  %v392_v25 = vmul.f32 %v1311_v0, %v337_v32  ;;  %v394_v32 = vmul.f32 %v1311_v0, %v339_v33 }
  0xa3   :  { %v1341_v3 = vmul.f32 %v948_v16, %v341_v11  ;;  %v1344_v6 = vmul.f32 %v948_v16, %v338_v35  ;;  %v393_v34 = vmul.f32 %v1311_v0, %v338_v35  ;;  %v396_v33 = vmul.f32 %v1311_v0, %v341_v11 }
  0xa4   :  { %v305_v7 = vpop.permute.xlu1 %304  ;;  %v299_v1 = vpop.permute.xlu0 %298 }
  0xa5   :  { %v343_v37 = vadd.f32 %v305_v7, %v1082_v39  ;;  %v340_v38 = vadd.f32 %v299_v1, %v1087_v40  ;;  %425 = vrot.lane.b32.xlu0 %v391_v36, %s877_s0  ;;  %423 = vrot.lane.b32.xlu1 %v390_v5, %s877_s0 }
  0xa7   :  { %v1353_v24 = vmul.f32 %v948_v16, %v343_v37  ;;  %v1356_v30 = vmul.f32 %v948_v16, %v340_v38  ;;  %v395_v5 = vmul.f32 %v1311_v0, %v340_v38  ;;  %v398_v11 = vmul.f32 %v1311_v0, %v343_v37 }
  0xa8   :  { %v309_v9 = vpop.permute.xlu1 %308  ;;  %v303_v15 = vpop.permute.xlu0 %302 }
  0xa9   :  { %v345_v39 = vadd.f32 %v309_v9, %v1096_v41  ;;  %v342_v40 = vadd.f32 %v303_v15, %v1101_v42  ;;  %429 = vrot.lane.b32.xlu0 %v393_v34, %s877_s0  ;;  %427 = vrot.lane.b32.xlu1 %v392_v25, %s877_s0 }
  0xab   :  { %v1365_v35 = vmul.f32 %v948_v16, %v345_v39  ;;  %v1368_v36 = vmul.f32 %v948_v16, %v342_v40  ;;  %v397_v38 = vmul.f32 %v1311_v0, %v342_v40 }
  0xac   :  { %v313_v7 = vpop.permute.xlu1 %312  ;;  %v307_v1 = vpop.permute.xlu0 %306 }
  0xad   :  { %v347_v41 = vadd.f32 %v313_v7, %v1110_v43  ;;  %v344_v42 = vadd.f32 %v307_v1, %v1115_v44  ;;  %433 = vrot.lane.b32.xlu0 %v395_v5, %s877_s0  ;;  %431 = vrot.lane.b32.xlu1 %v394_v32, %s877_s0 }
  0xaf   :  { %v1377_v34 = vmul.f32 %v948_v16, %v347_v41  ;;  %v1380_v25 = vmul.f32 %v948_v16, %v344_v42  ;;  %v399_v40 = vmul.f32 %v1311_v0, %v344_v42 }
  0xb0   :  { %v317_v9 = vpop.permute.xlu1 %316  ;;  %v311_v15 = vpop.permute.xlu0 %310 }
  0xb1   :  { %v349_v43 = vadd.f32 %v317_v9, %v1124_v45  ;;  %v346_v44 = vadd.f32 %v311_v15, %v1129_v46  ;;  %437 = vrot.lane.b32.xlu0 %v397_v38, %s877_s0  ;;  %435 = vrot.lane.b32.xlu1 %v396_v33, %s877_s0  ;;  %v400_v38 = vmul.f32 %v1311_v0, %v345_v39 }
  0xb2   :  { %v402_v15 = vmul.f32 %v1311_v0, %v347_v41 }
  0xb3   :  { %v1389_v5 = vmul.f32 %v948_v16, %v349_v43  ;;  %v1392_v32 = vmul.f32 %v948_v16, %v346_v44  ;;  %v401_v46 = vmul.f32 %v1311_v0, %v346_v44 }
  0xb4   :  { %v536_v7 = vpop.permute.xlu1 %535  ;;  %v315_v1 = vpop.permute.xlu0 %314 }
  0xb5   :  { %v348_v45 = vadd.f32 %v315_v1, %v1143_v48  ;;  %441 = vrot.lane.b32.xlu0 %v399_v40, %s877_s0  ;;  %439 = vrot.lane.b32.xlu1 %v398_v11, %s877_s0  ;;  %v404_v11 = vmul.f32 %v1311_v0, %v349_v43  ;;  %v1419_v1 = vadd.f32 %v536_v7, %v1138_v47 }
  0xb7   :  { %v1400_v42 = vmul.f32 %v948_v16, %v348_v45  ;;  %v403_v37 = vmul.f32 %v1311_v0, %v348_v45 }
  0xb8   :  { %v540_v33 = vpop.permute.xlu1 %539  ;;  %v534_v9 = vpop.permute.xlu0 %533 }
  0xb9   :  { %445 = vrot.lane.b32.xlu0 %v401_v46, %s877_s0  ;;  %443 = vrot.lane.b32.xlu1 %v400_v38, %s877_s0  ;;  %v1407_v48 = vadd.f32 %v534_v9, %v1157_v50  ;;  %v1431_v0 = vadd.f32 %v540_v33, %v1152_v49 }
  0xbb   :  { %v629_v16 = vmul.f32 %v1281_v26, %v1407_v48 }
  0xbc   :  { %v544_v40 = vpop.permute.xlu1 %543  ;;  %v538_v44 = vpop.permute.xlu0 %537 }
  0xbd   :  { %449 = vrot.lane.b32.xlu0 %v403_v37, %s877_s0  ;;  %447 = vrot.lane.b32.xlu1 %v402_v15, %s877_s0  ;;  %v1415_v39 = vadd.f32 %v538_v44, %v1171_v52  ;;  %v630_v52 = vmul.f32 %v1281_v26, %v1419_v1  ;;  %v1443_v9 = vadd.f32 %v544_v40, %v1166_v51 }
  0xbf   :  { %v631_v41 = vmul.f32 %v1281_v26, %v1415_v39 }
  0xc0   :  { %v542_v50 = vpop.permute.xlu0 %541  ;;  %v548_v45 = vpop.permute.xlu1 %547 }
  0xc1   :  { %661 = vrot.lane.b32.xlu0 %v629_v16, %s877_s0  ;;  %451 = vrot.lane.b32.xlu1 %v404_v11, %s877_s0  ;;  %v1426_v46 = vadd.f32 %v542_v50, %v1185_v54  ;;  %v632_v54 = vmul.f32 %v1281_v26, %v1431_v0  ;;  %v1455_v15 = vadd.f32 %v548_v45, %v1180_v53 }
  0xc3   :  { %v633_v43 = vmul.f32 %v1281_v26, %v1426_v46 }
  0xc4   :  { %v546_v47 = vpop.permute.xlu0 %545  ;;  %v552_v7 = vpop.permute.xlu1 %551 }
  0xc5   :  { %665 = vrot.lane.b32.xlu0 %v631_v41, %s877_s0  ;;  %663 = vrot.lane.b32.xlu1 %v630_v52, %s877_s0  ;;  %v1438_v38 = vadd.f32 %v546_v47, %v1199_v56  ;;  %v634_v56 = vmul.f32 %v1281_v26, %v1443_v9  ;;  %v1467_v11 = vadd.f32 %v552_v7, %v1194_v55 }
  0xc7   :  { %v635_v33 = vmul.f32 %v1281_v26, %v1438_v38 }
  0xc8   :  { %v550_v49 = vpop.permute.xlu0 %549  ;;  %v556_v51 = vpop.permute.xlu1 %555 }
  0xc9   :  { %669 = vrot.lane.b32.xlu0 %v633_v43, %s877_s0  ;;  %667 = vrot.lane.b32.xlu1 %v632_v54, %s877_s0  ;;  %v1450_v37 = vadd.f32 %v550_v49, %v1213_v58  ;;  %v636_v58 = vmul.f32 %v1281_v26, %v1455_v15  ;;  %v1479_v52 = vadd.f32 %v556_v51, %v1208_v57 }
  0xca   :  { %v1528_v51 = vadd.f32 %v1260_v14, %v971_v20  ;;  %v1812_v20 = vld [vmem:[#allocation7_spill] sm:$0xff]  ;;  %v1813_v14 = vld [vmem:[#allocation13_spill] sm:$0xff] }
  0xcb   :  { %v637_v40 = vmul.f32 %v1281_v26, %v1450_v37 }
  0xcc   :  { %v554_v44 = vpop.permute.xlu0 %553  ;;  %v560_v50 = vpop.permute.xlu1 %559 }
  0xcd   :  { %673 = vrot.lane.b32.xlu0 %v635_v33, %s877_s0  ;;  %671 = vrot.lane.b32.xlu1 %v634_v56, %s877_s0  ;;  %v1462_v16 = vadd.f32 %v554_v44, %v1227_v60  ;;  %v638_v60 = vmul.f32 %v1281_v26, %v1467_v11  ;;  %v1491_v7 = vadd.f32 %v560_v50, %v1222_v59 }
  0xce   :  { %v1504_v33 = vadd.f32 %v1254_v10, %v923_v8  ;;  %v1514_v44 = vadd.f32 %v1256_v12, %v957_v18  ;;  %v1519_v8 = vadd.f32 %v1258_v13, %v962_v19  ;;  %v1809_v18 = vld [vmem:[#allocation11_spill] sm:$0xff]  ;;  %v1810_v19 = vld [vmem:[#allocation6_spill] sm:$0xff]  ;;  %v1811_v13 = vld [vmem:[#allocation12_spill] sm:$0xff]  ;;  %v1547_v50 = vadd.f32 %v1813_v14, %v1812_v20 }
  0xcf   :  { %v639_v45 = vmul.f32 %v1281_v26, %v1462_v16  ;;  %v642_v49 = vmul.f32 %v1281_v26, %v1491_v7  ;;  %v1533_v12 = vadd.f32 %v1809_v18, %v976_v21  ;;  %v1814_v21 = vld [vmem:[#allocation8_spill] sm:$0xff] }
  0xd0   :  { %v558_v53 = vpop.permute.xlu0 %557  ;;  %v564_v54 = vpop.permute.xlu1 %563  ;;  %v163_v59 = vmul.f32 %v1281_v26, %v1504_v33  ;;  %v164_v10 = vmul.f32 %v1281_v26, %v1519_v8 }
  0xd1   :  { %677 = vrot.lane.b32.xlu0 %v637_v40, %s877_s0  ;;  %675 = vrot.lane.b32.xlu1 %v636_v58, %s877_s0  ;;  %v1474_v41 = vadd.f32 %v558_v53, %v1241_v62  ;;  %v640_v62 = vmul.f32 %v1281_v26, %v1479_v52  ;;  %v1538_v40 = vadd.f32 %v1811_v13, %v1810_v19  ;;  %v1820_v19 = vld [vmem:[#allocation5_spill] sm:$0xff] }
  0xd2   :  { %v167_v58 = vmul.f32 %v1281_v26, %v1528_v51  ;;  %v166_v53 = vmul.f32 %v1281_v26, %v1533_v12  ;;  %v137_v13 = vmul.f32 %v1820_v19, %v1278_v22 }
  0xd3   :  { %v641_v47 = vmul.f32 %v1281_v26, %v1474_v41 }
  0xd4   :  { %v562_v55 = vpop.permute.xlu0 %561 }
  0xd5   :  { %681 = vrot.lane.b32.xlu0 %v639_v45, %s877_s0  ;;  %679 = vrot.lane.b32.xlu1 %v638_v60, %s877_s0  ;;  %v1486_v43 = vadd.f32 %v562_v55, %v1250_v63  ;;  %v1500_v63 = vadd.f32 %v564_v54, %v1236_v61  ;;  %v165_v61 = vmul.f32 %v1281_v26, %v1514_v44  ;;  %v1815_v45 = vld [vmem:[#allocation14_spill] sm:$0xff]  ;;  %v1817_v54 = vld [vmem:[#allocation15_spill] sm:$0xff] }
  0xd6   :  { %v1552_v60 = vadd.f32 %v1815_v45, %v1814_v21  ;;  %v169_v55 = vmul.f32 %v1281_v26, %v1538_v40 }
  0xd7   :  { %v643_v57 = vmul.f32 %v1281_v26, %v1486_v43  ;;  %v644_v56 = vmul.f32 %v1281_v26, %v1500_v63 }
  0xd9   :  { %685 = vrot.lane.b32.xlu0 %v641_v47, %s877_s0  ;;  %683 = vrot.lane.b32.xlu1 %v640_v62, %s877_s0  ;;  %v168_v47 = vmul.f32 %v1281_v26, %v1547_v50  ;;  %v1816_v62 = vld [vmem:[#allocation9_spill] sm:$0xff] }
  0xdd   :  { %689 = vrot.lane.b32.xlu0 %v643_v57, %s877_s0  ;;  %687 = vrot.lane.b32.xlu1 %v642_v49, %s877_s0  ;;  %v1561_v57 = vadd.f32 %v1817_v54, %v1816_v62  ;;  %v171_v49 = vmul.f32 %v1281_v26, %v1552_v60 }
  0xe1   :  { %200 = vrot.lane.b32.xlu0 %v163_v59, %s877_s0  ;;  %691 = vrot.lane.b32.xlu1 %v644_v56, %s877_s0  ;;  %v170_v59 = vmul.f32 %v1281_v26, %v1561_v57  ;;  %v1818_v56 = vld [vmem:[#allocation10_spill] sm:$0xff] }
  0xe5   :  { %204 = vrot.lane.b32.xlu0 %v165_v61, %s877_s0  ;;  %202 = vrot.lane.b32.xlu1 %v164_v10, %s877_s0  ;;  %v1819_v61 = vld [vmem:[#allocation16_spill] sm:$0xff] }
  0xe6   :  { %v1571_v10 = vadd.f32 %v1819_v61, %v1818_v56  ;;  %v140_v61 = vmul.f32 %v1820_v19, %v1321_v29 }
  0xe8   :  { %v172_v18 = vmul.f32 %v1281_v26, %v1571_v10  ;;  %v139_v26 = vmul.f32 %v1820_v19, %v1294_v4  ;;  %v597_v4 = vmul.f32 %v1407_v48, %v1820_v19  ;;  %v598_v48 = vmul.f32 %v1419_v1, %v1820_v19 }
  0xe9   :  { %208 = vrot.lane.b32.xlu0 %v167_v58, %s877_s0  ;;  %206 = vrot.lane.b32.xlu1 %v166_v53, %s877_s0  ;;  %v136_v53 = vmul.f32 %v1820_v19, %v1275_v23  ;;  %v600_v1 = vmul.f32 %v1431_v0, %v1820_v19  ;;  %v602_v0 = vmul.f32 %v1443_v9, %v1820_v19 }
  0xed   :  { %212 = vrot.lane.b32.xlu0 %v169_v55, %s877_s0  ;;  %210 = vrot.lane.b32.xlu1 %v168_v47, %s877_s0  ;;  %v138_v47 = vmul.f32 %v1820_v19, %v1298_v17 }
  0xf1   :  { %216 = vrot.lane.b32.xlu0 %v171_v49, %s877_s0  ;;  %214 = vrot.lane.b32.xlu1 %v170_v59, %s877_s0  ;;  %v1821_v49 = vld [vmem:[#allocation18_spill] sm:$0xff] }
  0xf5   :  { %220 = vrot.lane.b32.xlu0 %v1305_v27, %s877_s0  ;;  %218 = vrot.lane.b32.xlu1 %v172_v18, %s877_s0 }
 0x10b   :  { %v193_v58 = vpop.permute.xlu0 %192  ;;  %v191_v14 = vpop.permute.xlu1 %190 }
 0x10c   :  { %v239_v20 = vadd.f32 %v193_v58, %v137_v13  ;;  %v238_v21 = vadd.f32 %v191_v14, %v136_v53 }
 0x10e   :  { %v368_v45 = vadd.f32 %v1287_v31, %v239_v20  ;;  %v367_v55 = vadd.f32 %v1317_v2, %v238_v21  ;;  %v599_v21 = vmul.f32 %v1415_v39, %v1820_v19  ;;  %v601_v39 = vmul.f32 %v1426_v46, %v1820_v19 }
 0x10f   :  { %v197_v27 = vpop.permute.xlu0 %196  ;;  %v195_v22 = vpop.permute.xlu1 %194  ;;  %v603_v46 = vmul.f32 %v1438_v38, %v1820_v19 }
 0x110   :  { %v241_v62 = vadd.f32 %v197_v27, %v139_v26  ;;  %v240_v54 = vadd.f32 %v195_v22, %v138_v47 }
 0x112   :  { %v370_v59 = vadd.f32 %v1821_v49, %v241_v62  ;;  %v369_v23 = vadd.f32 %v1333_v28, %v240_v54 }
 0x113   :  { %v422_v56 = vpop.permute.xlu0 %421  ;;  %v199_v58 = vpop.permute.xlu1 %198 }
 0x114   :  { %v469_v18 = vadd.f32 %v422_v56, %v367_v55  ;;  %v485_v13 = vadd.f32 %v422_v56, %v1317_v2  ;;  %v242_v17 = vadd.f32 %v199_v58, %v140_v61 }
 0x116   :  { %726 = vst.msk [vmem:[#allocation2] sm:$0xff] %vm725_vm2, %v469_v18  ;;  %v1597_v53 = vadd.f32 %v597_v4, %v485_v13  ;;  %v371_v20 = vadd.f32 %v1344_v6, %v242_v17 }
 0x117   :  { %v426_v14 = vpop.permute.xlu0 %425  ;;  %v424_v27 = vpop.permute.xlu1 %423 }
 0x118   :  { %v471_v26 = vadd.f32 %v426_v14, %v369_v23  ;;  %v487_v29 = vadd.f32 %v426_v14, %v1333_v28  ;;  %v470_v2 = vadd.f32 %v424_v27, %v368_v45  ;;  %v486_v55 = vadd.f32 %v424_v27, %v1287_v31 }
 0x11a   :  { %728 = vst.msk [vmem:[#allocation2 + $0x10] sm:$0xff] %vm725_vm2, %v471_v26  ;;  %v1607_v47 = vadd.f32 %v599_v21, %v487_v29  ;;  %727 = vst.msk [vmem:[#allocation2 + $0x8] sm:$0xff] %vm725_vm2, %v470_v2  ;;  %v1610_v22 = vadd.f32 %v598_v48, %v486_v55  ;;  %v604_v21 = vmul.f32 %v1455_v15, %v1820_v19 }
 0x11b   :  { %v430_v62 = vpop.permute.xlu0 %429  ;;  %v428_v23 = vpop.permute.xlu1 %427  ;;  %v607_v48 = vmul.f32 %v1462_v16, %v1820_v19  ;;  %v606_v55 = vmul.f32 %v1467_v11, %v1820_v19 }
 0x11c   :  { %v473_v28 = vadd.f32 %v430_v62, %v371_v20  ;;  %v489_v54 = vadd.f32 %v430_v62, %v1344_v6  ;;  %v472_v31 = vadd.f32 %v428_v23, %v370_v59  ;;  %v488_v45 = vadd.f32 %v428_v23, %v1821_v49  ;;  %v1822_v49 = vld [vmem:[#allocation19_spill] sm:$0xff] }
 0x11d   :  { %v605_v20 = vmul.f32 %v1450_v37, %v1820_v19 }
 0x11e   :  { %730 = vst.msk [vmem:[#allocation2 + $0x20] sm:$0xff] %vm725_vm2, %v473_v28  ;;  %v617_v56 = vadd.f32 %v601_v39, %v489_v54  ;;  %729 = vst.msk [vmem:[#allocation2 + $0x18] sm:$0xff] %vm725_vm2, %v472_v31  ;;  %v616_v4 = vadd.f32 %v600_v1, %v488_v45  ;;  %v609_v54 = vmul.f32 %v1474_v41, %v1820_v19 }
 0x11f   :  { %v1620_v61 = vpop.permute.xlu0 %433  ;;  %v1626_v18 = vpop.permute.xlu1 %431  ;;  %v608_v1 = vmul.f32 %v1479_v52, %v1820_v19 }
 0x120   :  { %v491_v6 = vadd.f32 %v1620_v61, %v1356_v30  ;;  %v490_v59 = vadd.f32 %v1626_v18, %v1822_v49 }
 0x122   :  { %v619_v13 = vadd.f32 %v603_v46, %v491_v6  ;;  %v618_v17 = vadd.f32 %v602_v0, %v490_v59  ;;  %v611_v6 = vmul.f32 %v1486_v43, %v1820_v19  ;;  %v610_v59 = vmul.f32 %v1491_v7, %v1820_v19 }
 0x123   :  { %v1632_v58 = vpop.permute.xlu0 %437  ;;  %v1638_v14 = vpop.permute.xlu1 %435  ;;  %v612_v43 = vmul.f32 %v1500_v63, %v1820_v19 }
 0x124   :  { %v493_v38 = vadd.f32 %v1632_v58, %v1368_v36  ;;  %v492_v9 = vadd.f32 %v1638_v14, %v1341_v3 }
 0x126   :  { %v621_v26 = vadd.f32 %v605_v20, %v493_v38  ;;  %v620_v27 = vadd.f32 %v604_v21, %v492_v9 }
 0x127   :  { %v1644_v29 = vpop.permute.xlu0 %441  ;;  %v1650_v2 = vpop.permute.xlu1 %439 }
 0x128   :  { %v495_v37 = vadd.f32 %v1644_v29, %v1380_v25  ;;  %v494_v15 = vadd.f32 %v1650_v2, %v1353_v24 }
 0x12a   :  { %v623_v62 = vadd.f32 %v607_v48, %v495_v37  ;;  %v622_v28 = vadd.f32 %v606_v55, %v494_v15 }
 0x12b   :  { %v1656_v39 = vpop.permute.xlu0 %445  ;;  %v1662_v23 = vpop.permute.xlu1 %443 }
 0x12c   :  { %v497_v16 = vadd.f32 %v1656_v39, %v1392_v32  ;;  %v496_v11 = vadd.f32 %v1662_v23, %v1365_v35 }
 0x12e   :  { %v625_v31 = vadd.f32 %v609_v54, %v497_v16  ;;  %v624_v46 = vadd.f32 %v608_v1, %v496_v11 }
 0x12f   :  { %v1668_v45 = vpop.permute.xlu0 %449  ;;  %v1674_v0 = vpop.permute.xlu1 %447 }
 0x130   :  { %v499_v41 = vadd.f32 %v1668_v45, %v1400_v42  ;;  %v498_v52 = vadd.f32 %v1674_v0, %v1377_v34 }
 0x132   :  { %v627_v20 = vadd.f32 %v611_v6, %v499_v41  ;;  %v626_v21 = vadd.f32 %v610_v59, %v498_v52 }
 0x133   :  { %v662_v38 = vpop.permute.xlu0 %661  ;;  %v1680_v9 = vpop.permute.xlu1 %451 }
 0x134   :  { %v709_v48 = vadd.f32 %v662_v38, %v1597_v53  ;;  %v500_v37 = vadd.f32 %v1680_v9, %v1389_v5 }
 0x136   :  { %758 = vrot.lane.b32.xlu1 %v709_v48, %s878_s10  ;;  %v628_v55 = vadd.f32 %v612_v43, %v500_v37 }
 0x137   :  { %v666_v7 = vpop.permute.xlu0 %665  ;;  %v664_v15 = vpop.permute.xlu1 %663 }
 0x138   :  { %v711_v54 = vadd.f32 %v666_v7, %v1607_v47  ;;  %v710_v16 = vadd.f32 %v664_v15, %v1610_v22 }
 0x13a   :  { %762 = vrot.lane.b32.xlu1 %v711_v54, %s878_s10  ;;  %760 = vrot.lane.b32.xlu0 %v710_v16, %s878_s10 }
 0x13b   :  { %v670_v53 = vpop.permute.xlu0 %669  ;;  %v668_v1 = vpop.permute.xlu1 %667 }
 0x13c   :  { %v713_v63 = vadd.f32 %v670_v53, %v617_v56  ;;  %v712_v11 = vadd.f32 %v668_v1, %v616_v4 }
 0x13e   :  { %766 = vrot.lane.b32.xlu1 %v713_v63, %s878_s10  ;;  %764 = vrot.lane.b32.xlu0 %v712_v11, %s878_s10  ;;  %v143_v63 = vmul.f32 %v1820_v19, %v1514_v44 }
 0x13f   :  { %v674_v6 = vpop.permute.xlu0 %673  ;;  %v672_v41 = vpop.permute.xlu1 %671 }
 0x140   :  { %v715_v59 = vadd.f32 %v674_v6, %v619_v13  ;;  %v714_v52 = vadd.f32 %v672_v41, %v618_v17 }
 0x142   :  { %770 = vrot.lane.b32.xlu1 %v715_v59, %s878_s10  ;;  %768 = vrot.lane.b32.xlu0 %v714_v52, %s878_s10  ;;  %v144_v59 = vmul.f32 %v1820_v19, %v1533_v12  ;;  %v146_v12 = vmul.f32 %v1820_v19, %v1547_v50  ;;  %v148_v50 = vmul.f32 %v1820_v19, %v1561_v57 }
 0x143   :  { %v678_v47 = vpop.permute.xlu0 %677  ;;  %v676_v22 = vpop.permute.xlu1 %675  ;;  %v150_v57 = vmul.f32 %v1820_v19, %v1571_v10 }
 0x144   :  { %v717_v38 = vadd.f32 %v678_v47, %v621_v26  ;;  %v716_v48 = vadd.f32 %v676_v22, %v620_v27 }
 0x146   :  { %774 = vrot.lane.b32.xlu1 %v717_v38, %s878_s10  ;;  %772 = vrot.lane.b32.xlu0 %v716_v48, %s878_s10 }
 0x147   :  { %v682_v56 = vpop.permute.xlu0 %681  ;;  %v680_v4 = vpop.permute.xlu1 %679 }
 0x148   :  { %v719_v43 = vadd.f32 %v682_v56, %v623_v62  ;;  %v718_v37 = vadd.f32 %v680_v4, %v622_v28  ;;  %v141_v62 = vmul.f32 %v1820_v19, %v1504_v33 }
 0x14a   :  { %778 = vrot.lane.b32.xlu1 %v719_v43, %s878_s10  ;;  %776 = vrot.lane.b32.xlu0 %v718_v37, %s878_s10 }
 0x14b   :  { %v686_v13 = vpop.permute.xlu0 %685  ;;  %v684_v17 = vpop.permute.xlu1 %683 }
 0x14c   :  { %v721_v7 = vadd.f32 %v686_v13, %v625_v31  ;;  %v720_v15 = vadd.f32 %v684_v17, %v624_v46 }
 0x14e   :  { %782 = vrot.lane.b32.xlu1 %v721_v7, %s878_s10  ;;  %780 = vrot.lane.b32.xlu0 %v720_v15, %s878_s10 }
 0x14f   :  { %v690_v26 = vpop.permute.xlu0 %689  ;;  %v688_v27 = vpop.permute.xlu1 %687 }
 0x150   :  { %v723_v54 = vadd.f32 %v690_v26, %v627_v20  ;;  %v722_v16 = vadd.f32 %v688_v27, %v626_v21  ;;  %v142_v20 = vmul.f32 %v1820_v19, %v1519_v8 }
 0x152   :  { %786 = vrot.lane.b32.xlu1 %v723_v54, %s878_s10  ;;  %784 = vrot.lane.b32.xlu0 %v722_v16, %s878_s10 }
 0x153   :  { %v201_v28 = vpop.permute.xlu0 %200  ;;  %v692_v53 = vpop.permute.xlu1 %691 }
 0x154   :  { %v243_v1 = vadd.f32 %v201_v28, %v141_v62  ;;  %v724_v31 = vadd.f32 %v692_v53, %v628_v55 }
 0x156   :  { %v372_v46 = vadd.f32 %v1822_v49, %v243_v1  ;;  %788 = vrot.lane.b32.xlu0 %v724_v31, %s878_s10  ;;  %v145_v49 = vmul.f32 %v1820_v19, %v1528_v51  ;;  %v147_v51 = vmul.f32 %v1820_v19, %v1538_v40  ;;  %v149_v40 = vmul.f32 %v1820_v19, %v1552_v60  ;;  %v1823_v60 = vld [vmem:[#allocation17_spill] sm:$0xff] }
 0x157   :  { %v205_v21 = vpop.permute.xlu0 %204  ;;  %v203_v33 = vpop.permute.xlu1 %202  ;;  %v151_v15 = vmul.f32 %v1820_v19, %v1823_v60 }
 0x158   :  { %v474_v11 = vadd.f32 %v1626_v18, %v372_v46  ;;  %v245_v6 = vadd.f32 %v205_v21, %v143_v63  ;;  %v244_v41 = vadd.f32 %v203_v33, %v142_v20 }
 0x15a   :  { %731 = vst.msk [vmem:[#allocation2 + $0x28] sm:$0xff] %vm725_vm2, %v474_v11  ;;  %v374_v55 = vadd.f32 %v1341_v3, %v245_v6  ;;  %v373_v44 = vadd.f32 %v1356_v30, %v244_v41 }
 0x15b   :  { %v209_v52 = vpop.permute.xlu0 %208  ;;  %v207_v47 = vpop.permute.xlu1 %206 }
 0x15c   :  { %v476_v8 = vadd.f32 %v1638_v14, %v374_v55  ;;  %v247_v18 = vadd.f32 %v209_v52, %v145_v49  ;;  %v475_v22 = vadd.f32 %v1620_v61, %v373_v44  ;;  %v246_v38 = vadd.f32 %v207_v47, %v144_v59 }
 0x15e   :  { %733 = vst.msk [vmem:[#allocation2 + $0x38] sm:$0xff] %vm725_vm2, %v476_v8  ;;  %v376_v3 = vadd.f32 %v1353_v24, %v247_v18  ;;  %732 = vst.msk [vmem:[#allocation2 + $0x30] sm:$0xff] %vm725_vm2, %v475_v22  ;;  %v375_v30 = vadd.f32 %v1368_v36, %v246_v38 }
 0x15f   :  { %v213_v14 = vpop.permute.xlu0 %212  ;;  %v211_v56 = vpop.permute.xlu1 %210 }
 0x160   :  { %v478_v48 = vadd.f32 %v1650_v2, %v376_v3  ;;  %v249_v61 = vadd.f32 %v213_v14, %v147_v51  ;;  %v477_v4 = vadd.f32 %v1632_v58, %v375_v30  ;;  %v248_v43 = vadd.f32 %v211_v56, %v146_v12 }
 0x162   :  { %735 = vst.msk [vmem:[#allocation2 + $0x48] sm:$0xff] %vm725_vm2, %v478_v48  ;;  %v378_v24 = vadd.f32 %v1365_v35, %v249_v61  ;;  %734 = vst.msk [vmem:[#allocation2 + $0x40] sm:$0xff] %vm725_vm2, %v477_v4  ;;  %v377_v36 = vadd.f32 %v1380_v25, %v248_v43 }
 0x163   :  { %v217_v2 = vpop.permute.xlu0 %216  ;;  %v215_v13 = vpop.permute.xlu1 %214 }
 0x164   :  { %v480_v37 = vadd.f32 %v1662_v23, %v378_v24  ;;  %v251_v58 = vadd.f32 %v217_v2, %v149_v40  ;;  %v479_v17 = vadd.f32 %v1644_v29, %v377_v36  ;;  %v250_v7 = vadd.f32 %v215_v13, %v148_v50 }
 0x166   :  { %737 = vst.msk [vmem:[#allocation2 + $0x58] sm:$0xff] %vm725_vm2, %v480_v37  ;;  %v380_v35 = vadd.f32 %v1377_v34, %v251_v58  ;;  %736 = vst.msk [vmem:[#allocation2 + $0x50] sm:$0xff] %vm725_vm2, %v479_v17  ;;  %v379_v25 = vadd.f32 %v1392_v32, %v250_v7 }
 0x167   :  { %v221_v23 = vpop.permute.xlu0 %220  ;;  %v219_v27 = vpop.permute.xlu1 %218 }
 0x168   :  { %v482_v26 = vadd.f32 %v1674_v0, %v380_v35  ;;  %v253_v29 = vadd.f32 %v221_v23, %v151_v15  ;;  %v481_v54 = vadd.f32 %v1656_v39, %v379_v25  ;;  %v252_v16 = vadd.f32 %v219_v27, %v150_v57 }
 0x16a   :  { %739 = vst.msk [vmem:[#allocation2 + $0x68] sm:$0xff] %vm725_vm2, %v482_v26  ;;  %v382_v34 = vadd.f32 %v1389_v5, %v253_v29  ;;  %738 = vst.msk [vmem:[#allocation2 + $0x60] sm:$0xff] %vm725_vm2, %v481_v54  ;;  %v381_v62 = vadd.f32 %v1400_v42, %v252_v16 }
 0x16c   :  { %v484_v32 = vadd.f32 %v1680_v9, %v382_v34  ;;  %v483_v10 = vadd.f32 %v1668_v45, %v381_v62 }
 0x16e   :  { %741 = vst.msk [vmem:[#allocation2 + $0x78] sm:$0xff] %vm725_vm2, %v484_v32  ;;  %740 = vst.msk [vmem:[#allocation2 + $0x70] sm:$0xff] %vm725_vm2, %v483_v10 }
 0x1a8   :  { %v759_v19 = vpop.permute.xlu1 %758 }
 0x1a9   :  { %807 = vst.msk [vmem:[#allocation2] sm:$0xff] %vm806_vm3, %v759_v19 }
 0x1ac   :  { %v763_v39 = vpop.permute.xlu1 %762  ;;  %v761_v0 = vpop.permute.xlu0 %760 }
 0x1ad   :  { %809 = vst.msk [vmem:[#allocation2 + $0x10] sm:$0xff] %vm806_vm3, %v763_v39  ;;  %808 = vst.msk [vmem:[#allocation2 + $0x8] sm:$0xff] %vm806_vm3, %v761_v0 }
 0x1b0   :  { %v767_v5 = vpop.permute.xlu1 %766  ;;  %v765_v42 = vpop.permute.xlu0 %764 }
 0x1b1   :  { %811 = vst.msk [vmem:[#allocation2 + $0x20] sm:$0xff] %vm806_vm3, %v767_v5  ;;  %810 = vst.msk [vmem:[#allocation2 + $0x18] sm:$0xff] %vm806_vm3, %v765_v42 }
 0x1b4   :  { %v771_v45 = vpop.permute.xlu1 %770  ;;  %v769_v9 = vpop.permute.xlu0 %768 }
 0x1b5   :  { %813 = vst.msk [vmem:[#allocation2 + $0x30] sm:$0xff] %vm806_vm3, %v771_v45  ;;  %812 = vst.msk [vmem:[#allocation2 + $0x28] sm:$0xff] %vm806_vm3, %v769_v9 }
 0x1b8   :  { %v775_v28 = vpop.permute.xlu1 %774  ;;  %v773_v53 = vpop.permute.xlu0 %772 }
 0x1b9   :  { %815 = vst.msk [vmem:[#allocation2 + $0x40] sm:$0xff] %vm806_vm3, %v775_v28  ;;  %814 = vst.msk [vmem:[#allocation2 + $0x38] sm:$0xff] %vm806_vm3, %v773_v53 }
 0x1bc   :  { %v779_v1 = vpop.permute.xlu1 %778  ;;  %v777_v31 = vpop.permute.xlu0 %776 }
 0x1bd   :  { %817 = vst.msk [vmem:[#allocation2 + $0x50] sm:$0xff] %vm806_vm3, %v779_v1  ;;  %816 = vst.msk [vmem:[#allocation2 + $0x48] sm:$0xff] %vm806_vm3, %v777_v31 }
 0x1c0   :  { %v783_v46 = vpop.permute.xlu1 %782  ;;  %v781_v63 = vpop.permute.xlu0 %780 }
 0x1c1   :  { %819 = vst.msk [vmem:[#allocation2 + $0x60] sm:$0xff] %vm806_vm3, %v783_v46  ;;  %818 = vst.msk [vmem:[#allocation2 + $0x58] sm:$0xff] %vm806_vm3, %v781_v63 }
 0x1c4   :  { %v787_v20 = vpop.permute.xlu1 %786  ;;  %v785_v21 = vpop.permute.xlu0 %784 }
 0x1c5   :  { %821 = vst.msk [vmem:[#allocation2 + $0x70] sm:$0xff] %vm806_vm3, %v787_v20  ;;  %820 = vst.msk [vmem:[#allocation2 + $0x68] sm:$0xff] %vm806_vm3, %v785_v21 }
 0x1c8   :  { %v789_v11 = vpop.permute.xlu0 %788 }
 0x1c9   :  { %822 = vst.msk [vmem:[#allocation2 + $0x78] sm:$0xff] %vm806_vm3, %v789_v11 }
 0x1ca   :  { %863 = shalt.err (!%p860_p4)
}
 0x1cb   :  { %s880_s23 = smov 128   ;;  %s881_s24 = smov 8  }
 0x1cc   :  { %834 = dma.vmem_to_hbm [thread:$0]  %s829_s21, 2048, %s1780_s1, [#allocation3], %s880_s23, %s880_s23, %s881_s24  }
 0x1cd   :  { %872 = dma.done.wait [#allocation3], 2048  }
 0x1ce   :  { %873 = vsyncadd [#allocation3], 4294965248 }
 0x1cf   :  { %838 = vsyncpa [#allocation3], 1 }

</bundles_post_ra>
